<compile_context>
chip_gen: v7x
topology: tpu7x:2x2x1
jax: 0.10.0
libtpu: 0.0.40
codegen_flags: <defaults>
</compile_context>

<pallas_src>
import jax
import jax.numpy as jnp
from jax.experimental import pallas as pl
from jax.experimental.pallas import tpu as pltpu

NEG_SLOPE = 0.01          # nn.LeakyReLU default negative_slope
EXPANSION = 4
LANE = 128


def _leaky(y):
    # mul + max (2 VALU ops) instead of cmp + mul + select.
    return jnp.maximum(y, NEG_SLOPE * y)


def _round_up(n, m):
    return ((n + m - 1) // m) * m


# ----------------------------------------------------------------------------
# Fused kernel: one image per grid step, all intermediates in VMEM.
# ----------------------------------------------------------------------------
def bottleneck_kernel(x_ref, w1_ref, b1_ref, w2_ref, b2_ref, w3_ref, b3_ref,
                      o_ref, xcol_ref):
    # x_ref    : (H, W, Cp)        f32  (batch squeezed; channels padded to 128k)
    # w1_ref   : (Cp, Mp)          bf16 BN1 scale folded in
    # w2_ref   : (3, 3*Mp, Mp)     bf16 [kh, kw*Mp + ci, co], BN2 scale folded
    # w3_ref   : (Mp, Cp)          bf16 BN3 scale folded in
    # b*_ref   : (1, Mp)/(1, Cp)   f32  folded BN biases
    # o_ref    : (H, W, Cp)        f32
    # xcol_ref : (H+2, W, 3*Mp)    bf16 halo-padded conv1 output, kw taps on lanes
    H, W, Cp = x_ref.shape
    Mp = w1_ref.shape[1]
    K2 = 3 * Mp

    # ---- conv1 (1x1) + bn1 + LeakyReLU --------------------------------------
    x2d = x_ref[...].reshape(H * W, Cp)
    y1 = jnp.dot(x2d.astype(jnp.bfloat16), w1_ref[...],
                 preferred_element_type=jnp.float32)
    h1 = _leaky(y1 + b1_ref[...]).astype(jnp.bfloat16).reshape(H, W, Mp)

    # ---- build halo-padded conv2 input in VMEM -------------------------------
    # xcol[h', w, kw*Mp + c] == zero-padded conv1 output at (h' - 1, w + kw - 1, c)
    zero_row = jnp.zeros((W, K2), jnp.bfloat16)
    zero_col = jnp.zeros((H, 1, Mp), jnp.bfloat16)
    xcol_ref[0] = zero_row                                       # top halo row
    xcol_ref[H + 1] = zero_row                                   # bottom halo row
    xcol_ref[1:H + 1, 0:1, 0 * Mp:1 * Mp] = zero_col             # kw=0 left edge
    xcol_ref[1:H + 1, W - 1:W, 2 * Mp:3 * Mp] = zero_col         # kw=2 right edge
    xcol_ref[1:H + 1, :, 1 * Mp:2 * Mp] = h1                     # kw=1 (aligned)
    xcol_ref[1:H + 1, 1:W, 0 * Mp:1 * Mp] = h1[:, 0:W - 1, :]    # kw=0 (shift)
    xcol_ref[1:H + 1, 0:W - 1, 2 * Mp:3 * Mp] = h1[:, 1:W, :]    # kw=2 (shift)

    # ---- conv2 (3x3, stride 1, pad 1): 3 matmuls with K = 3*Mp ---------------
    acc = jnp.dot(xcol_ref[0:H].reshape(H * W, K2), w2_ref[0],
                  preferred_element_type=jnp.float32)
    acc = acc + jnp.dot(xcol_ref[1:H + 1].reshape(H * W, K2), w2_ref[1],
                        preferred_element_type=jnp.float32)
    acc = acc + jnp.dot(xcol_ref[2:H + 2].reshape(H * W, K2), w2_ref[2],
                        preferred_element_type=jnp.float32)
    h2 = _leaky(acc + b2_ref[...]).astype(jnp.bfloat16)

    # ---- conv3 (1x1) + bn3 + residual + LeakyReLU ----------------------------
    y3 = jnp.dot(h2, w3_ref[...], preferred_element_type=jnp.float32)
    # Re-read x for the residual here (keeps the f32 image out of the matmul
    # section's live range).
    y3 = y3 + b3_ref[...] + x_ref[...].reshape(H * W, Cp)
    o_ref[...] = _leaky(y3).reshape(H, W, Cp)


# ----------------------------------------------------------------------------
# pallas_call wrapper
# ----------------------------------------------------------------------------
def bottleneck_fused(x_nhwc, p):
    N, H, W, Cp = x_nhwc.shape
    Mp = p["w1"].shape[1]

    # VMEM budget: double-buffered activation blocks + (also double-buffered)
    # weight/bias blocks + xcol scratch + live temporaries + headroom.
    est = (2 * H * W * Cp * 4                                   # x blocks
           + 2 * H * W * Cp * 4                                 # out blocks
           + 2 * (Cp * Mp + 3 * 3 * Mp * Mp + Mp * Cp) * 2      # weights (bf16) x2
           + 2 * (2 * Mp + Cp) * 4                              # biases x2
           + (H + 2) * W * 3 * Mp * 2                           # xcol scratch
           + H * W * (Mp * 4 + Mp * 2 + 3 * Mp * 2 + Cp * 4)    # live temporaries
           + (8 << 20))                                         # compiler headroom
    try:
        cap = int(pltpu.get_tpu_info().vmem_capacity_bytes)
    except Exception:
        cap = 64 << 20
    vmem_limit = int(min(max(est, 32 << 20), int(0.75 * cap)))

    return pl.pallas_call(
        bottleneck_kernel,
        out_shape=jax.ShapeDtypeStruct((N, H, W, Cp), jnp.float32),
        grid=(N,),
        in_specs=[
            pl.BlockSpec((None, H, W, Cp), lambda n: (n, 0, 0, 0)),
            pl.BlockSpec((Cp, Mp), lambda n: (0, 0)),            # resident weights
            pl.BlockSpec((1, Mp), lambda n: (0, 0)),
            pl.BlockSpec((3, 3 * Mp, Mp), lambda n: (0, 0, 0)),
            pl.BlockSpec((1, Mp), lambda n: (0, 0)),
            pl.BlockSpec((Mp, Cp), lambda n: (0, 0)),
            pl.BlockSpec((1, Cp), lambda n: (0, 0)),
        ],
        out_specs=pl.BlockSpec((None, H, W, Cp), lambda n: (n, 0, 0, 0)),
        scratch_shapes=[
            pltpu.VMEM((H + 2, W, 3 * Mp), jnp.bfloat16),
        ],
        compiler_params=pltpu.CompilerParams(
            dimension_semantics=("parallel",),
            vmem_limit_bytes=vmem_limit,
        ),
    )(x_nhwc, p["w1"], p["b1"], p["w2"], p["b2"], p["w3"], p["b3"])


def bottleneck_forward(x_nchw, params):
    x = jnp.transpose(x_nchw, (0, 2, 3, 1))       # NCHW -> NHWC (channels -> lanes)
    N, H, W, Cin = x.shape
    Cp = params["w3"].shape[1]                    # padded output channels
    assert W % 8 == 0, "W must be a multiple of 8 (sublane alignment)"
    assert Cin <= Cp, "in_channel must equal out_channel * expansion (downsample=None)"
    if Cp != Cin:
        x = jnp.pad(x, ((0, 0), (0, 0), (0, 0), (0, Cp - Cin)))
    out = bottleneck_fused(x, params)
    out = out[..., :Cin]                          # Cout == Cin in the valid config
    return jnp.transpose(out, (0, 3, 1, 2))       # NHWC -> NCHW


# ----------------------------------------------------------------------------
# Deterministic parameters + BN folding + 128-lane channel padding (wrapper-time)
# ----------------------------------------------------------------------------
def init_raw_params(key, in_channel, out_channel, groups=1, width_per_group=64):
    width = int(out_channel * (width_per_group / 64.0)) * groups
    cexp = out_channel * EXPANSION
    keys = jax.random.split(key, 15)

    def bn(kg, kb, km, kv, c):
        gamma = jax.random.uniform(kg, (c,), jnp.float32, 0.5, 1.5)
        beta = 0.1 * jax.random.normal(kb, (c,), jnp.float32)
        mean = 0.1 * jax.random.normal(km, (c,), jnp.float32)
        var = jax.random.uniform(kv, (c,), jnp.float32, 0.5, 1.5)
        scale = gamma / jnp.sqrt(var + 1e-5)
        bias = beta - mean * scale
        return scale, bias

    # Weight layouts (vs torch):
    #   w1: (Cin, width)       == conv1.weight[:, :, 0, 0].T
    #   w2: (9, width, width)  == conv2.weight[:, :, kh, kw].T at tap kh*3+kw
    #   w3: (width, Cout*4)    == conv3.weight[:, :, 0, 0].T
    w1 = 0.1 * jax.random.normal(keys[0], (in_channel, width), jnp.float32)
    w2 = 0.1 * jax.random.normal(keys[1], (9, width, width), jnp.float32)
    w3 = 0.1 * jax.random.normal(keys[2], (width, cexp), jnp.float32)

    s1, b1 = bn(keys[3], keys[4], keys[5], keys[6], width)
    s2, b2 = bn(keys[7], keys[8], keys[9], keys[10], width)
    s3, b3 = bn(keys[11], keys[12], keys[13], keys[14], cexp)
    return dict(w1=w1, w2=w2, w3=w3, s1=s1, b1=b1, s2=s2, b2=b2, s3=s3, b3=b3)


def fold_params(raw):
    """Fold BN scale into the conv weights, pad channels to multiples of 128,
    reshape w2 to (3, 3*Mp, Mp) (kw folded into the contraction), cast weights
    to bf16 (f32 accumulation happens in-kernel)."""
    w1, w2, w3 = raw["w1"], raw["w2"], raw["w3"]
    Cin, M = w1.shape
    Cout = w3.shape[1]
    Cp = max(_round_up(Cin, LANE), _round_up(Cout, LANE))
    Mp = _round_up(M, LANE)

    w1f = w1 * raw["s1"][None, :]
    w2f = (w2 * raw["s2"][None, None, :]).reshape(3, 3, M, M)   # [kh, kw, ci, co]
    w3f = w3 * raw["s3"][None, :]

    w1p = jnp.zeros((Cp, Mp), jnp.float32).at[:Cin, :M].set(w1f)
    w2p = jnp.zeros((3, 3, Mp, Mp), jnp.float32).at[:, :, :M, :M].set(w2f)
    w2p = w2p.reshape(3, 3 * Mp, Mp)                            # [kh, kw*Mp+ci, co]
    w3p = jnp.zeros((Mp, Cp), jnp.float32).at[:M, :Cout].set(w3f)

    b1p = jnp.zeros((1, Mp), jnp.float32).at[0, :M].set(raw["b1"])
    b2p = jnp.zeros((1, Mp), jnp.float32).at[0, :M].set(raw["b2"])
    b3p = jnp.zeros((1, Cp), jnp.float32).at[0, :Cout].set(raw["b3"])

    return dict(
        w1=w1p.astype(jnp.bfloat16), b1=b1p,
        w2=w2p.astype(jnp.bfloat16), b2=b2p,
        w3=w3p.astype(jnp.bfloat16), b3=b3p,
    )


# ----------------------------------------------------------------------------
# Pure-JAX reference (f32) for a correctness check
# ----------------------------------------------------------------------------
def bottleneck_ref(x_nchw, raw):
    x = jnp.transpose(x_nchw, (0, 2, 3, 1))
    dn = ("NHWC", "HWIO", "NHWC")

    def bn(h, s, b):
        return h * s.reshape(1, 1, 1, -1) + b.reshape(1, 1, 1, -1)

    h = jax.lax.conv_general_dilated(x, raw["w1"][None, None], (1, 1), "VALID",
                                     dimension_numbers=dn)
    h = _leaky(bn(h, raw["s1"], raw["b1"]))
    w2 = raw["w2"].reshape(3, 3, raw["w2"].shape[1], raw["w2"].shape[2])
    h = jax.lax.conv_general_dilated(h, w2, (1, 1), ((1, 1), (1, 1)),
                                     dimension_numbers=dn)
    h = _leaky(bn(h, raw["s2"], raw["b2"]))
    h = jax.lax.conv_general_dilated(h, raw["w3"][None, None], (1, 1), "VALID",
                                     dimension_numbers=dn)
    h = _leaky(bn(h, raw["s3"], raw["b3"]) + x)
    return jnp.transpose(h, (0, 3, 1, 2))


if __name__ == "__main__":
    key = jax.random.PRNGKey(0)
    kx, kp = jax.random.split(key)

    # in_channel == out_channel * expansion so the residual add is valid with
    # downsample=None (the reference module's shape-consistent configuration).
    in_channel, out_channel = 16, 4
    N, H, W = 2, 16, 16

    x = jax.random.normal(kx, (N, in_channel, H, W), jnp.float32)
    raw = init_raw_params(kp, in_channel, out_channel)
    params = fold_params(raw)

    fwd = jax.jit(bottleneck_forward)
    y = jax.block_until_ready(fwd(x, params))

    assert y.shape == (N, out_channel * EXPANSION, H, W), y.shape
    assert y.dtype == jnp.float32

    # Correctness vs. the f32 reference (bf16 matmuls keep the error tiny here).
    y_ref = bottleneck_ref(x, raw)
    err = float(jnp.max(jnp.abs(y - y_ref)))
    assert err < 5e-2, f"max |err| = {err}"

    print("KERNEL_OK")
</pallas_src>

<mosaic_0001>
module attributes {stable_mosaic.version = 11 : i64} {
  func.func @bottleneck_kernel(%arg0: i32, %arg1: memref<1x16x16x128xf32, #tpu.memory_space<vmem>>, %arg2: memref<128x128xbf16, #tpu.memory_space<vmem>>, %arg3: memref<1x128xf32, #tpu.memory_space<vmem>>, %arg4: memref<3x384x128xbf16, #tpu.memory_space<vmem>>, %arg5: memref<1x128xf32, #tpu.memory_space<vmem>>, %arg6: memref<128x128xbf16, #tpu.memory_space<vmem>>, %arg7: memref<1x128xf32, #tpu.memory_space<vmem>>, %arg8: memref<1x16x16x128xf32, #tpu.memory_space<vmem>>, %arg9: memref<18x16x384xbf16, #tpu.memory_space<vmem>>) attributes {dimension_semantics = [#tpu.dimension_semantics<parallel>], iteration_bounds = array<i64: 2>, scalar_prefetch = 0 : i64, scratch_operands = 1 : i64, tpu.core_type = #tpu.core_type<tc>, window_params = [{transform_indices = @transform_0, window_bounds = array<i64: 1, 16, 16, 128>}, {pipeline_mode = #tpu.pipeline_mode<synchronous>, transform_indices = @transform_1, window_bounds = array<i64: 128, 128>}, {pipeline_mode = #tpu.pipeline_mode<synchronous>, transform_indices = @transform_2, window_bounds = array<i64: 1, 128>}, {pipeline_mode = #tpu.pipeline_mode<synchronous>, transform_indices = @transform_3, window_bounds = array<i64: 3, 384, 128>}, {pipeline_mode = #tpu.pipeline_mode<synchronous>, transform_indices = @transform_4, window_bounds = array<i64: 1, 128>}, {pipeline_mode = #tpu.pipeline_mode<synchronous>, transform_indices = @transform_5, window_bounds = array<i64: 128, 128>}, {pipeline_mode = #tpu.pipeline_mode<synchronous>, transform_indices = @transform_6, window_bounds = array<i64: 1, 128>}, {transform_indices = @transform_7, window_bounds = array<i64: 1, 16, 16, 128>}]} {
    %c0 = arith.constant 0 : index
    %c0_0 = arith.constant 0 : index
    %c0_1 = arith.constant 0 : index
    %c0_2 = arith.constant 0 : index
    %0 = vector.load %arg1[%c0, %c0_0, %c0_1, %c0_2] : memref<1x16x16x128xf32, #tpu.memory_space<vmem>>, vector<1x16x16x128xf32>
    %1 = vector.shape_cast %0 : vector<1x16x16x128xf32> to vector<16x16x128xf32>
    %2 = vector.shape_cast %1 : vector<16x16x128xf32> to vector<256x128xf32>
    %3 = arith.truncf %2 : vector<256x128xf32> to vector<256x128xbf16>
    %c0_3 = arith.constant 0 : index
    %c0_4 = arith.constant 0 : index
    %4 = vector.load %arg2[%c0_3, %c0_4] : memref<128x128xbf16, #tpu.memory_space<vmem>>, vector<128x128xbf16>
    %cst = arith.constant dense<0.000000e+00> : vector<256x128xf32>
    %5 = tpu.matmul %3, %4, %cst {dimension_numbers = #tpu.dot_dimension_numbers<[1], [0], [0], [1], [0, 0, 1, 1], [], []>} : vector<256x128xbf16>, vector<128x128xbf16>, vector<256x128xf32> -> vector<256x128xf32>
    %c0_5 = arith.constant 0 : index
    %c0_6 = arith.constant 0 : index
    %6 = vector.load %arg3[%c0_5, %c0_6] : memref<1x128xf32, #tpu.memory_space<vmem>>, vector<1x128xf32>
    %7 = vector.broadcast %6 : vector<1x128xf32> to vector<256x128xf32>
    %8 = arith.addf %5, %7 : vector<256x128xf32>
    %cst_7 = arith.constant 0.00999999977 : f32
    %9 = vector.broadcast %cst_7 : f32 to vector<256x128xf32>
    %10 = arith.mulf %9, %8 : vector<256x128xf32>
    %11 = arith.maximumf %8, %10 : vector<256x128xf32>
    %12 = arith.truncf %11 : vector<256x128xf32> to vector<256x128xbf16>
    %13 = vector.shape_cast %12 : vector<256x128xbf16> to vector<16x16x128xbf16>
    %cst_8 = arith.constant 0.000000e+00 : bf16
    %14 = vector.broadcast %cst_8 : bf16 to vector<16x384xbf16>
    %cst_9 = arith.constant 0.000000e+00 : bf16
    %15 = vector.broadcast %cst_9 : bf16 to vector<16x1x128xbf16>
    %c0_10 = arith.constant 0 : index
    %c0_11 = arith.constant 0 : index
    %c0_12 = arith.constant 0 : index
    %16 = vector.load %arg9[%c0_10, %c0_11, %c0_12] : memref<18x16x384xbf16, #tpu.memory_space<vmem>>, vector<1x16x384xbf16>
    %17 = vector.shape_cast %16 : vector<1x16x384xbf16> to vector<16x384xbf16>
    %18 = vector.shape_cast %14 : vector<16x384xbf16> to vector<1x16x384xbf16>
    tpu.vector_store %arg9[%c0_10, %c0_11, %c0_12], %18 {strides = array<i32>} : memref<18x16x384xbf16, #tpu.memory_space<vmem>>, vector<1x16x384xbf16>,
    %c17 = arith.constant 17 : index
    %c0_13 = arith.constant 0 : index
    %c0_14 = arith.constant 0 : index
    %19 = vector.load %arg9[%c17, %c0_13, %c0_14] : memref<18x16x384xbf16, #tpu.memory_space<vmem>>, vector<1x16x384xbf16>
    %20 = vector.shape_cast %19 : vector<1x16x384xbf16> to vector<16x384xbf16>
    %21 = vector.shape_cast %14 : vector<16x384xbf16> to vector<1x16x384xbf16>
    tpu.vector_store %arg9[%c17, %c0_13, %c0_14], %21 {strides = array<i32>} : memref<18x16x384xbf16, #tpu.memory_space<vmem>>, vector<1x16x384xbf16>,
    %c1 = arith.constant 1 : index
    %c0_15 = arith.constant 0 : index
    %c0_16 = arith.constant 0 : index
    %22 = vector.load %arg9[%c1, %c0_15, %c0_16] : memref<18x16x384xbf16, #tpu.memory_space<vmem>>, vector<16x1x128xbf16>
    tpu.vector_store %arg9[%c1, %c0_15, %c0_16], %15 {strides = array<i32>} : memref<18x16x384xbf16, #tpu.memory_space<vmem>>, vector<16x1x128xbf16>,
    %c1_17 = arith.constant 1 : index
    %c15 = arith.constant 15 : index
    %c256 = arith.constant 256 : index
    %23 = vector.load %arg9[%c1_17, %c15, %c256] : memref<18x16x384xbf16, #tpu.memory_space<vmem>>, vector<16x1x128xbf16>
    tpu.vector_store %arg9[%c1_17, %c15, %c256], %15 {strides = array<i32>} : memref<18x16x384xbf16, #tpu.memory_space<vmem>>, vector<16x1x128xbf16>,
    %c1_18 = arith.constant 1 : index
    %c0_19 = arith.constant 0 : index
    %c128 = arith.constant 128 : index
    %24 = vector.load %arg9[%c1_18, %c0_19, %c128] : memref<18x16x384xbf16, #tpu.memory_space<vmem>>, vector<16x16x128xbf16>
    tpu.vector_store %arg9[%c1_18, %c0_19, %c128], %13 {strides = array<i32>} : memref<18x16x384xbf16, #tpu.memory_space<vmem>>, vector<16x16x128xbf16>,
    %25 = vector.extract_strided_slice %13 {offsets = [0, 0, 0], sizes = [16, 15, 128], strides = [1, 1, 1]} : vector<16x16x128xbf16> to vector<16x15x128xbf16>
    %c1_20 = arith.constant 1 : index
    %c1_21 = arith.constant 1 : index
    %c0_22 = arith.constant 0 : index
    %26 = vector.load %arg9[%c1_20, %c1_21, %c0_22] : memref<18x16x384xbf16, #tpu.memory_space<vmem>>, vector<16x15x128xbf16>
    tpu.vector_store %arg9[%c1_20, %c1_21, %c0_22], %25 {strides = array<i32>} : memref<18x16x384xbf16, #tpu.memory_space<vmem>>, vector<16x15x128xbf16>,
    %27 = vector.extract_strided_slice %13 {offsets = [0, 1, 0], sizes = [16, 15, 128], strides = [1, 1, 1]} : vector<16x16x128xbf16> to vector<16x15x128xbf16>
    %c1_23 = arith.constant 1 : index
    %c0_24 = arith.constant 0 : index
    %c256_25 = arith.constant 256 : index
    %28 = vector.load %arg9[%c1_23, %c0_24, %c256_25] : memref<18x16x384xbf16, #tpu.memory_space<vmem>>, vector<16x15x128xbf16>
    tpu.vector_store %arg9[%c1_23, %c0_24, %c256_25], %27 {strides = array<i32>} : memref<18x16x384xbf16, #tpu.memory_space<vmem>>, vector<16x15x128xbf16>,
    %c0_26 = arith.constant 0 : index
    %c0_27 = arith.constant 0 : index
    %c0_28 = arith.constant 0 : index
    %29 = vector.load %arg9[%c0_26, %c0_27, %c0_28] : memref<18x16x384xbf16, #tpu.memory_space<vmem>>, vector<16x16x384xbf16>
    %30 = vector.shape_cast %29 : vector<16x16x384xbf16> to vector<256x384xbf16>
    %c0_29 = arith.constant 0 : index
    %c0_30 = arith.constant 0 : index
    %c0_31 = arith.constant 0 : index
    %31 = vector.load %arg4[%c0_29, %c0_30, %c0_31] : memref<3x384x128xbf16, #tpu.memory_space<vmem>>, vector<1x384x128xbf16>
    %32 = vector.shape_cast %31 : vector<1x384x128xbf16> to vector<384x128xbf16>
    %cst_32 = arith.constant dense<0.000000e+00> : vector<256x128xf32>
    %33 = tpu.matmul %30, %32, %cst_32 {dimension_numbers = #tpu.dot_dimension_numbers<[1], [0], [0], [1], [0, 0, 1, 1], [], []>} : vector<256x384xbf16>, vector<384x128xbf16>, vector<256x128xf32> -> vector<256x128xf32>
    %c1_33 = arith.constant 1 : index
    %c0_34 = arith.constant 0 : index
    %c0_35 = arith.constant 0 : index
    %34 = vector.load %arg9[%c1_33, %c0_34, %c0_35] : memref<18x16x384xbf16, #tpu.memory_space<vmem>>, vector<16x16x384xbf16>
    %35 = vector.shape_cast %34 : vector<16x16x384xbf16> to vector<256x384xbf16>
    %c1_36 = arith.constant 1 : index
    %c0_37 = arith.constant 0 : index
    %c0_38 = arith.constant 0 : index
    %36 = vector.load %arg4[%c1_36, %c0_37, %c0_38] : memref<3x384x128xbf16, #tpu.memory_space<vmem>>, vector<1x384x128xbf16>
    %37 = vector.shape_cast %36 : vector<1x384x128xbf16> to vector<384x128xbf16>
    %cst_39 = arith.constant dense<0.000000e+00> : vector<256x128xf32>
    %38 = tpu.matmul %35, %37, %cst_39 {dimension_numbers = #tpu.dot_dimension_numbers<[1], [0], [0], [1], [0, 0, 1, 1], [], []>} : vector<256x384xbf16>, vector<384x128xbf16>, vector<256x128xf32> -> vector<256x128xf32>
    %39 = arith.addf %33, %38 : vector<256x128xf32>
    %c2 = arith.constant 2 : index
    %c0_40 = arith.constant 0 : index
    %c0_41 = arith.constant 0 : index
    %40 = vector.load %arg9[%c2, %c0_40, %c0_41] : memref<18x16x384xbf16, #tpu.memory_space<vmem>>, vector<16x16x384xbf16>
    %41 = vector.shape_cast %40 : vector<16x16x384xbf16> to vector<256x384xbf16>
    %c2_42 = arith.constant 2 : index
    %c0_43 = arith.constant 0 : index
    %c0_44 = arith.constant 0 : index
    %42 = vector.load %arg4[%c2_42, %c0_43, %c0_44] : memref<3x384x128xbf16, #tpu.memory_space<vmem>>, vector<1x384x128xbf16>
    %43 = vector.shape_cast %42 : vector<1x384x128xbf16> to vector<384x128xbf16>
    %cst_45 = arith.constant dense<0.000000e+00> : vector<256x128xf32>
    %44 = tpu.matmul %41, %43, %cst_45 {dimension_numbers = #tpu.dot_dimension_numbers<[1], [0], [0], [1], [0, 0, 1, 1], [], []>} : vector<256x384xbf16>, vector<384x128xbf16>, vector<256x128xf32> -> vector<256x128xf32>
    %45 = arith.addf %39, %44 : vector<256x128xf32>
    %c0_46 = arith.constant 0 : index
    %c0_47 = arith.constant 0 : index
    %46 = vector.load %arg5[%c0_46, %c0_47] : memref<1x128xf32, #tpu.memory_space<vmem>>, vector<1x128xf32>
    %47 = vector.broadcast %46 : vector<1x128xf32> to vector<256x128xf32>
    %48 = arith.addf %45, %47 : vector<256x128xf32>
    %cst_48 = arith.constant 0.00999999977 : f32
    %49 = vector.broadcast %cst_48 : f32 to vector<256x128xf32>
    %50 = arith.mulf %49, %48 : vector<256x128xf32>
    %51 = arith.maximumf %48, %50 : vector<256x128xf32>
    %52 = arith.truncf %51 : vector<256x128xf32> to vector<256x128xbf16>
    %c0_49 = arith.constant 0 : index
    %c0_50 = arith.constant 0 : index
    %53 = vector.load %arg6[%c0_49, %c0_50] : memref<128x128xbf16, #tpu.memory_space<vmem>>, vector<128x128xbf16>
    %cst_51 = arith.constant dense<0.000000e+00> : vector<256x128xf32>
    %54 = tpu.matmul %52, %53, %cst_51 {dimension_numbers = #tpu.dot_dimension_numbers<[1], [0], [0], [1], [0, 0, 1, 1], [], []>} : vector<256x128xbf16>, vector<128x128xbf16>, vector<256x128xf32> -> vector<256x128xf32>
    %c0_52 = arith.constant 0 : index
    %c0_53 = arith.constant 0 : index
    %55 = vector.load %arg7[%c0_52, %c0_53] : memref<1x128xf32, #tpu.memory_space<vmem>>, vector<1x128xf32>
    %56 = vector.broadcast %55 : vector<1x128xf32> to vector<256x128xf32>
    %57 = arith.addf %54, %56 : vector<256x128xf32>
    %c0_54 = arith.constant 0 : index
    %c0_55 = arith.constant 0 : index
    %c0_56 = arith.constant 0 : index
    %c0_57 = arith.constant 0 : index
    %58 = vector.load %arg1[%c0_54, %c0_55, %c0_56, %c0_57] : memref<1x16x16x128xf32, #tpu.memory_space<vmem>>, vector<1x16x16x128xf32>
    %59 = vector.shape_cast %58 : vector<1x16x16x128xf32> to vector<16x16x128xf32>
    %60 = vector.shape_cast %59 : vector<16x16x128xf32> to vector<256x128xf32>
    %61 = arith.addf %57, %60 : vector<256x128xf32>
    %cst_58 = arith.constant 0.00999999977 : f32
    %62 = vector.broadcast %cst_58 : f32 to vector<256x128xf32>
    %63 = arith.mulf %62, %61 : vector<256x128xf32>
    %64 = arith.maximumf %61, %63 : vector<256x128xf32>
    %65 = vector.shape_cast %64 : vector<256x128xf32> to vector<16x16x128xf32>
    %c0_59 = arith.constant 0 : index
    %c0_60 = arith.constant 0 : index
    %c0_61 = arith.constant 0 : index
    %c0_62 = arith.constant 0 : index
    %66 = vector.load %arg8[%c0_59, %c0_60, %c0_61, %c0_62] : memref<1x16x16x128xf32, #tpu.memory_space<vmem>>, vector<1x16x16x128xf32>
    %67 = vector.shape_cast %66 : vector<1x16x16x128xf32> to vector<16x16x128xf32>
    %68 = vector.shape_cast %65 : vector<16x16x128xf32> to vector<1x16x16x128xf32>
    tpu.vector_store %arg8[%c0_59, %c0_60, %c0_61, %c0_62], %68 {strides = array<i32>} : memref<1x16x16x128xf32, #tpu.memory_space<vmem>>, vector<1x16x16x128xf32>,
    return
  }
  func.func @transform_0(%arg0: i32) -> (i32, i32, i32, i32) {
    %c0_i32 = arith.constant 0 : i32
    %c0_i32_0 = arith.constant 0 : i32
    %c0_i32_1 = arith.constant 0 : i32
    %c0_i32_2 = arith.constant 0 : i32
    return %arg0, %c0_i32, %c0_i32_0, %c0_i32_1 : i32, i32, i32, i32
  }
  func.func @transform_1(%arg0: i32) -> (i32, i32) {
    %c0_i32 = arith.constant 0 : i32
    %c0_i32_0 = arith.constant 0 : i32
    %c0_i32_1 = arith.constant 0 : i32
    return %c0_i32, %c0_i32_0 : i32, i32
  }
  func.func @transform_2(%arg0: i32) -> (i32, i32) {
    %c0_i32 = arith.constant 0 : i32
    %c0_i32_0 = arith.constant 0 : i32
    %c0_i32_1 = arith.constant 0 : i32
    return %c0_i32, %c0_i32_0 : i32, i32
  }
  func.func @transform_3(%arg0: i32) -> (i32, i32, i32) {
    %c0_i32 = arith.constant 0 : i32
    %c0_i32_0 = arith.constant 0 : i32
    %c0_i32_1 = arith.constant 0 : i32
    %c0_i32_2 = arith.constant 0 : i32
    return %c0_i32, %c0_i32_0, %c0_i32_1 : i32, i32, i32
  }
  func.func @transform_4(%arg0: i32) -> (i32, i32) {
    %c0_i32 = arith.constant 0 : i32
    %c0_i32_0 = arith.constant 0 : i32
    %c0_i32_1 = arith.constant 0 : i32
    return %c0_i32, %c0_i32_0 : i32, i32
  }
  func.func @transform_5(%arg0: i32) -> (i32, i32) {
    %c0_i32 = arith.constant 0 : i32
    %c0_i32_0 = arith.constant 0 : i32
    %c0_i32_1 = arith.constant 0 : i32
    return %c0_i32, %c0_i32_0 : i32, i32
  }
  func.func @transform_6(%arg0: i32) -> (i32, i32) {
    %c0_i32 = arith.constant 0 : i32
    %c0_i32_0 = arith.constant 0 : i32
    %c0_i32_1 = arith.constant 0 : i32
    return %c0_i32, %c0_i32_0 : i32, i32
  }
  func.func @transform_7(%arg0: i32) -> (i32, i32, i32, i32) {
    %c0_i32 = arith.constant 0 : i32
    %c0_i32_0 = arith.constant 0 : i32
    %c0_i32_1 = arith.constant 0 : i32
    %c0_i32_2 = arith.constant 0 : i32
    return %arg0, %c0_i32, %c0_i32_0, %c0_i32_1 : i32, i32, i32, i32
  }
}

</mosaic_0001>

<bundles_post_ra>
// kernel: bottleneck_forward.1
= control target key start
LH: loop header
LB: loop body
LE: loop exit
PB: predicated region body
PF: predicated region fallthrough
CT: control target
= control target key end

     0   :  { %s4549_s24 = smov 0   ;;  %s5842_s0 = inlined_call_operand.vmem [shape: f32[2,16,16,128], index: 0, kind: input, shape index: {}]   ;;  %s5843_s1 = inlined_call_operand.vmem [shape: bf16[128,128], index: 1, kind: input, shape index: {}]   ;;  %s5844_s2 = inlined_call_operand.vmem [shape: f32[1,128], index: 2, kind: input, shape index: {}]   ;;  %s5845_s3 = inlined_call_operand.vmem [shape: bf16[3,384,128], index: 3, kind: input, shape index: {}]   ;;  %s5846_s4 = inlined_call_operand.vmem [shape: f32[1,128], index: 4, kind: input, shape index: {}]   ;;  %s5847_s5 = inlined_call_operand.vmem [shape: bf16[128,128], index: 5, kind: input, shape index: {}]   ;;  %s5848_s6 = inlined_call_operand.vmem [shape: f32[1,128], index: 6, kind: input, shape index: {}]   ;;  %s5849_s7 = inlined_call_operand.vmem [shape: f32[2,16,16,128], index: 7, kind: output, shape index: {}]  }
   0x1 LB: > { %s3330_s25 = sadd.s32 4294967295, %s4506_s24   ;;  %p3334_p0 = scmp.ge.s32.totalorder %s4506_s24, 1  ;;  %s4506_s24 = sphi %s4549_s24, %s17_s24  }
   0x2   : > { %p237_p1 = scmp.lt.s32.totalorder %s4506_s24, 3 }
   0x4   : > { %p238_p2 = pnand %p3334_p0, %p237_p1 }
   0x5   : > { %v4411_v0 = vld [vmem:[%s5843_s1] sm:$0xff] (!%p238_p2)   ;;  %p269_p3 = scmp.lt.s32.totalorder (!%p238_p2), %s3330_s25, 1  ;;  %v4412_v1 = vld [vmem:[%s5843_s1 + $0x8] sm:$0xff] (!%p238_p2)   ;;  %v4413_v2 = vld [vmem:[%s5843_s1 + $0x10] sm:$0xff] (!%p238_p2)   ;;  %vm648_vm0 = vcmask (!%p238_p2), 1040384   ;;  %vm699_vm2 = vcmask (!%p238_p2), 1047559  }
   0x6   : > { %241 = sbr.rel (%p238_p2) target bundleno = 1034 (0x40a), region = 48  ;;  %3986 = vmatprep.subr.bf16.mxu0 (!%p238_p2), %v4411_v0  ;;  %4226 = vmatprep.subr.bf16.mxu1 (!%p238_p2), %v4411_v0  ;;  %v4414_v3 = vld [vmem:[%s5843_s1 + $0x18] sm:$0xff] (!%p238_p2)   ;;  %v4415_v7 = vld [vmem:[%s5843_s1 + $0x20] sm:$0xff] (!%p238_p2)   ;;  %v4416_v11 = vld [vmem:[%s5843_s1 + $0x28] sm:$0xff] (!%p238_p2)   ;;  %vm649_vm1 = vsmask.f32 (!%p238_p2), 256 }
   0x7   : > { %3987 = vmatpush3.bf16.msra.mxu0 (!%p238_p2), %v4411_v0  ;;  %4234 = vmatpush3.bf16.msra.mxu1 (!%p238_p2), %v4411_v0  ;;  %v4417_v12 = vld [vmem:[%s5843_s1 + $0x30] sm:$0xff] (!%p238_p2)   ;;  %v4418_v13 = vld [vmem:[%s5843_s1 + $0x38] sm:$0xff] (!%p238_p2)   ;;  %v4420_v20 = vld [vmem:[%s5845_s3 + $0x140] sm:$0xff] (!%p238_p2)   ;;  %vm700_vm3 = vsmask.f32 (!%p238_p2), 7966  ;;  %vm894_vm6 = vcmask (!%p238_p2), 1047552  }
   0x8   : > { %3988 = vmatprep.subr.bf16.mxu0 (!%p238_p2), %v4412_v1  ;;  %4227 = vmatprep.subr.bf16.mxu1 (!%p238_p2), %v4412_v1  ;;  %v4419_v23 = vld [vmem:[%s5845_s3 + $0x100] sm:$0xff] (!%p238_p2)   ;;  %v4422_v28 = vld [vmem:[%s5845_s3 + $0x108] sm:$0xff] (!%p238_p2)   ;;  %v4425_v62 = vld [vmem:[%s5845_s3 + $0x110] sm:$0xff] (!%p238_p2)   ;;  %vm895_vm7 = vsmask.f32 (!%p238_p2), 7938 }
   0x9   : > { %v4421_v25 = vld [vmem:[%s5845_s3 + $0xc0] sm:$0xff] (!%p238_p2)   ;;  %v4423_v30 = vld [vmem:[%s5845_s3 + $0x148] sm:$0xff] (!%p238_p2)   ;;  %v4426_v63 = vld [vmem:[%s5845_s3 + $0x150] sm:$0xff] (!%p238_p2)   ;;  %vm993_vm8 = vsmask.f32 (!%p238_p2), 7424 }
   0xa   : > { %v4424_v61 = vld [vmem:[%s5845_s3 + $0xc8] sm:$0xff] (!%p238_p2)   ;;  %v4427_v0 = vld [vmem:[%s5845_s3 + $0xd0] sm:$0xff] (!%p238_p2)   ;;  %vm4671_vm4 = vmand (!%p238_p2), %vm648_vm0, %vm649_vm1 }
   0xb   : > { %3989 = vmatpush3.bf16.msra.mxu0 (!%p238_p2), %v4412_v1  ;;  %4235 = vmatpush3.bf16.msra.mxu1 (!%p238_p2), %v4412_v1  ;;  %v4428_v1 = vld [vmem:[%s5845_s3 + $0x118] sm:$0xff] (!%p238_p2)   ;;  %vm4677_vm5 = vmand (!%p238_p2), %vm699_vm2, %vm700_vm3 }
   0xc   : > { %3990 = vmatprep.subr.bf16.mxu0 (!%p238_p2), %v4413_v2  ;;  %4228 = vmatprep.subr.bf16.mxu1 (!%p238_p2), %v4413_v2  ;;  %vm4824_vm9 = vmand (!%p238_p2), %vm894_vm6, %vm895_vm7 }
   0xd   : > { %s5859_s25 = smov (!%p269_p3, %s3330_s25), 1  ;;  %vm4830_vm10 = vmand %vm894_vm6, %vm993_vm8 }
   0xe   : > { %s3528_s9 = sshll.u32 %s5859_s25, 8 }
   0xf   : > { %s4574_s12 = scalar_lea.vmem %s5842_s0, %s3528_s9  ;;  %3991 = vmatpush3.bf16.msra.mxu0 %v4413_v2  ;;  %4236 = vmatpush3.bf16.msra.mxu1 %v4413_v2  ;;  %v4429_v2 = vld [vmem:[%s5845_s3 + $0x158] sm:$0xff]   ;;  %s5749_s20 = scalar_lea.vmem %s5849_s7, %s3528_s9 }
  0x10   : > { %v280_v4 = vld [vmem:[%s4574_s12] sm:$0xff]  ;;  %v281_v5 = vld [vmem:[%s4574_s12 + $0x8] sm:$0xff]  ;;  %3992 = vmatprep.subr.bf16.mxu0 %v4414_v3  ;;  %4229 = vmatprep.subr.bf16.mxu1 %v4414_v3  ;;  %v282_v14 = vld [vmem:[%s4574_s12 + $0x10] sm:$0xff] }
  0x11   : > { %v312_v6 = vpack.c.bf16 %v281_v5, %v280_v4  ;;  %v296_v8 = vld [vmem:[%s4574_s12 + $0x80] sm:$0xff]  ;;  %v297_v9 = vld [vmem:[%s4574_s12 + $0x88] sm:$0xff]  ;;  %v283_v15 = vld [vmem:[%s4574_s12 + $0x18] sm:$0xff] }
  0x12   : > { %v320_v10 = vpack.c.bf16 %v297_v9, %v296_v8  ;;  %v284_v16 = vld [vmem:[%s4574_s12 + $0x20] sm:$0xff]  ;;  %v285_v17 = vld [vmem:[%s4574_s12 + $0x28] sm:$0xff]  ;;  %v298_v18 = vld [vmem:[%s4574_s12 + $0x90] sm:$0xff]  ;;  %v313_v24 = vpack.c.bf16 %v283_v15, %v282_v14 }
  0x13   : > { %4002 = vmatprep.mubr.bf16.mxu0 %v312_v6  ;;  %3993 = vmatpush3.bf16.msra.mxu0 %v4414_v3  ;;  %v299_v19 = vld [vmem:[%s4574_s12 + $0x98] sm:$0xff]  ;;  %v300_v21 = vld [vmem:[%s4574_s12 + $0xa0] sm:$0xff]  ;;  %v301_v22 = vld [vmem:[%s4574_s12 + $0xa8] sm:$0xff]  ;;  %v314_v26 = vpack.c.bf16 %v285_v17, %v284_v16 }
  0x14   : > { %3994 = vmatprep.subr.bf16.mxu0 %v4415_v7  ;;  %4237 = vmatpush3.bf16.msra.mxu1 %v4414_v3  ;;  %v321_v27 = vpack.c.bf16 %v299_v19, %v298_v18  ;;  %v322_v29 = vpack.c.bf16 %v301_v22, %v300_v21  ;;  %v286_v31 = vld [vmem:[%s4574_s12 + $0x30] sm:$0xff]  ;;  %v287_v32 = vld [vmem:[%s4574_s12 + $0x38] sm:$0xff]  ;;  %v288_v33 = vld [vmem:[%s4574_s12 + $0x40] sm:$0xff] }
  0x15   : > { %4230 = vmatprep.subr.bf16.mxu1 %v4415_v7  ;;  %4018 = vmatprep.mubr.bf16.mxu1 %v320_v10  ;;  %v289_v34 = vld [vmem:[%s4574_s12 + $0x48] sm:$0xff]  ;;  %v302_v35 = vld [vmem:[%s4574_s12 + $0xb0] sm:$0xff]  ;;  %v303_v36 = vld [vmem:[%s4574_s12 + $0xb8] sm:$0xff]  ;;  %v315_v39 = vpack.c.bf16 %v287_v32, %v286_v31 }
  0x16   : > { %v304_v37 = vld [vmem:[%s4574_s12 + $0xc0] sm:$0xff]  ;;  %v305_v38 = vld [vmem:[%s4574_s12 + $0xc8] sm:$0xff]  ;;  %v316_v40 = vpack.c.bf16 %v289_v34, %v288_v33  ;;  %v323_v41 = vpack.c.bf16 %v303_v36, %v302_v35  ;;  %v290_v43 = vld [vmem:[%s4574_s12 + $0x50] sm:$0xff] }
  0x17   : > { %3995 = vmatpush3.bf16.msra.mxu0 %v4415_v7  ;;  %v324_v42 = vpack.c.bf16 %v305_v38, %v304_v37  ;;  %v291_v44 = vld [vmem:[%s4574_s12 + $0x58] sm:$0xff]  ;;  %v292_v45 = vld [vmem:[%s4574_s12 + $0x60] sm:$0xff]  ;;  %v293_v46 = vld [vmem:[%s4574_s12 + $0x68] sm:$0xff] }
  0x18   : > { %3996 = vmatprep.subr.bf16.mxu0 %v4416_v11  ;;  %4238 = vmatpush3.bf16.msra.mxu1 %v4415_v7  ;;  %v306_v47 = vld [vmem:[%s4574_s12 + $0xd0] sm:$0xff]  ;;  %v307_v48 = vld [vmem:[%s4574_s12 + $0xd8] sm:$0xff]  ;;  %v308_v49 = vld [vmem:[%s4574_s12 + $0xe0] sm:$0xff]  ;;  %v317_v51 = vpack.c.bf16 %v291_v44, %v290_v43  ;;  %v318_v52 = vpack.c.bf16 %v293_v46, %v292_v45 }
  0x19   : > { %4231 = vmatprep.subr.bf16.mxu1 %v4416_v11  ;;  %v309_v50 = vld [vmem:[%s4574_s12 + $0xe8] sm:$0xff]  ;;  %v325_v53 = vpack.c.bf16 %v307_v48, %v306_v47  ;;  %v294_v55 = vld [vmem:[%s4574_s12 + $0x70] sm:$0xff]  ;;  %v295_v56 = vld [vmem:[%s4574_s12 + $0x78] sm:$0xff] }
  0x1a   : > { %v326_v54 = vpack.c.bf16 %v309_v50, %v308_v49  ;;  %v310_v57 = vld [vmem:[%s4574_s12 + $0xf0] sm:$0xff]  ;;  %v311_v58 = vld [vmem:[%s4574_s12 + $0xf8] sm:$0xff]  ;;  %v319_v59 = vpack.c.bf16 %v295_v56, %v294_v55  ;;  %v4431_v4 = vld [vmem:[%s5845_s3 + $0x120] sm:$0xff]  }
  0x1b   : > { %3997 = vmatpush3.bf16.msra.mxu0 %v4416_v11  ;;  %v327_v60 = vpack.c.bf16 %v311_v58, %v310_v57  ;;  %v4430_v3 = vld [vmem:[%s5845_s3 + $0xd8] sm:$0xff]   ;;  %v4432_v5 = vld [vmem:[%s5845_s3 + $0x160] sm:$0xff]   ;;  %v4434_v7 = vld [vmem:[%s5845_s3 + $0x128] sm:$0xff]  }
  0x1c   : > { %3998 = vmatprep.subr.bf16.mxu0 %v4417_v12  ;;  %4239 = vmatpush3.bf16.msra.mxu1 %v4416_v11  ;;  %v4433_v6 = vld [vmem:[%s5845_s3 + $0xe0] sm:$0xff]   ;;  %v654_v9 = vld [vmem:[#allocation2 + $0x30] sm:$0x1]  ;;  %v702_v14 = vld [vmem:[#allocation2 + $0x28] sm:$0x80] }
  0x1d   : > { %4232 = vmatprep.subr.bf16.mxu1 %v4417_v12  ;;  %v705_v10 = vld [vmem:[#allocation2 + $0x40] sm:$0x80]  ;;  %v655_v11 = vsel %vm4671_vm4, 0, %v654_v9  ;;  %v703_v17 = vsel %vm4677_vm5, 0, %v702_v14  ;;  %v4435_v18 = vld [vmem:[%s5845_s3 + $0x168] sm:$0xff]   ;;  %v4438_v21 = vld [vmem:[%s5845_s3 + $0x170] sm:$0xff]  }
  0x1e   : > { %656 = vst [vmem:[#allocation2 + $0x30] sm:$0x1] %v655_v11  ;;  %v706_v15 = vsel %vm4677_vm5, 0, %v705_v10  ;;  %v4436_v19 = vld [vmem:[%s5845_s3 + $0xe8] sm:$0xff]   ;;  %704 = vst [vmem:[#allocation2 + $0x28] sm:$0x80] %v703_v17 }
  0x1f   : > { %3999 = vmatpush3.bf16.msra.mxu0 %v4417_v12  ;;  %707 = vst [vmem:[#allocation2 + $0x40] sm:$0x80] %v706_v15  ;;  %v4439_v22 = vld [vmem:[%s5845_s3 + $0xf0] sm:$0xff]   ;;  %v708_v32 = vld [vmem:[#allocation2 + $0x58] sm:$0x80] }
  0x20   : > { %4000 = vmatprep.subr.bf16.mxu0 %v4418_v13  ;;  %4240 = vmatpush3.bf16.msra.mxu1 %v4417_v12  ;;  %v709_v33 = vsel %vm4677_vm5, 0, %v708_v32  ;;  %v666_v34 = vld [vmem:[#allocation2 + $0x90] sm:$0x1]  ;;  %v717_v35 = vld [vmem:[#allocation2 + $0xa0] sm:$0x80] }
  0x21   : > { %4233 = vmatprep.subr.bf16.mxu1 %v4418_v13  ;;  %710 = vst [vmem:[#allocation2 + $0x58] sm:$0x80] %v709_v33  ;;  %v667_v36 = vsel %vm4671_vm4, 0, %v666_v34  ;;  %v718_v37 = vsel %vm4677_vm5, 0, %v717_v35  ;;  %v663_v38 = vld [vmem:[#allocation2 + $0x78] sm:$0x1] }
  0x22   : > { %668 = vst [vmem:[#allocation2 + $0x90] sm:$0x1] %v667_v36  ;;  %719 = vst [vmem:[#allocation2 + $0xa0] sm:$0x80] %v718_v37  ;;  %v723_v43 = vld [vmem:[#allocation2 + $0xd0] sm:$0x80] }
  0x23   : > { %4001 = vmatpush3.bf16.msra.mxu0 %v4418_v13  ;;  %v724_v45 = vsel %vm4677_vm5, 0, %v723_v43  ;;  %v669_v46 = vld [vmem:[#allocation2 + $0xa8] sm:$0x1]  ;;  %v720_v48 = vld [vmem:[#allocation2 + $0xb8] sm:$0x80] }
  0x24   : > { %4241 = vmatpush3.bf16.msra.mxu1 %v4418_v13  ;;  %4034 = vmatprep.subr.bf16.mxu0 %v4420_v20  ;;  %v651_v13 = vld [vmem:[#allocation2 + $0x18] sm:$0x1]  ;;  %725 = vst [vmem:[#allocation2 + $0xd0] sm:$0x80] %v724_v45  ;;  %v670_v47 = vsel %vm4671_vm4, 0, %v669_v46  ;;  %v721_v49 = vsel %vm4677_vm5, 0, %v720_v48 }
  0x25   : > { %3554 = vmatprep.subr.bf16.mxu1 %v4419_v23  ;;  %v652_v16 = vsel %vm4671_vm4, 0, %v651_v13  ;;  %v4440_v23 = vld [vmem:[%s5845_s3 + $0x138] sm:$0xff]   ;;  %671 = vst [vmem:[#allocation2 + $0xa8] sm:$0x1] %v670_v47  ;;  %v678_v50 = vld [vmem:[#allocation2 + $0xf0] sm:$0x1] }
  0x26   : > { %4003 = vmatmul.mubr.bf16.vlgmr.msra.gmra.mrb[0].mxu0 %v313_v24  ;;  %653 = vst [vmem:[#allocation2 + $0x18] sm:$0x1] %v652_v16  ;;  %v4441_v24 = vld [vmem:[%s5845_s3 + $0x178] sm:$0xff]   ;;  %722 = vst [vmem:[#allocation2 + $0xb8] sm:$0x80] %v721_v49 }
  0x27   : > { %4006 = vmatprep.mubr.bf16.mxu0 %v314_v26  ;;  %4019 = vmatmul.mubr.bf16.vlgmr.msra.gmra.mrb[0].mxu1 %v321_v27  ;;  %v660_v26 = vld [vmem:[#allocation2 + $0x60] sm:$0x1]  ;;  %v726_v55 = vld [vmem:[#allocation2 + $0xe8] sm:$0x80]  ;;  %v747_v15 = vld [vmem:[#allocation2 + $0x190] sm:$0x80] }
  0x28   : > { %4022 = vmatprep.mubr.bf16.mxu1 %v322_v29  ;;  %3555 = vmatpush3.bf16.msra.mxu1 %v4421_v25  ;;  %v4442_v25 = vld [vmem:[%s5845_s3 + $0xf8] sm:$0xff]   ;;  %v661_v27 = vsel %vm4671_vm4, 0, %v660_v26  ;;  %v657_v29 = vld [vmem:[#allocation2 + $0x48] sm:$0x1]  ;;  %v727_v57 = vsel %vm4677_vm5, 0, %v726_v55  ;;  %v748_v16 = vsel %vm4677_vm5, 0, %v747_v15 }
  0x29   : > { %4035 = vmatpush3.bf16.msra.mxu0 %v4420_v20  ;;  %3556 = vmatprep.subr.bf16.mxu1 %v4422_v28  ;;  %v4437_v20 = vld [vmem:[%s5845_s3 + $0x130] sm:$0xff]   ;;  %662 = vst [vmem:[#allocation2 + $0x60] sm:$0x1] %v661_v27  ;;  %v658_v31 = vsel %vm4671_vm4, 0, %v657_v29  ;;  %728 = vst [vmem:[#allocation2 + $0xe8] sm:$0x80] %v727_v57 }
  0x2a   : > { %4036 = vmatprep.subr.bf16.mxu0 %v4423_v30  ;;  %v711_v28 = vld [vmem:[#allocation2 + $0x70] sm:$0x80]  ;;  %659 = vst [vmem:[#allocation2 + $0x48] sm:$0x1] %v658_v31  ;;  %v684_v58 = vld [vmem:[#allocation2 + $0x120] sm:$0x1] }
  0x2b   : > { %v738_v10 = vld [vmem:[#allocation2 + $0x148] sm:$0x80]  ;;  %v696_v13 = vld [vmem:[#allocation2 + $0x180] sm:$0x1]  ;;  %v693_v17 = vld [vmem:[#allocation2 + $0x168] sm:$0x1] }
  0x2c   : > { %3557 = vmatpush3.bf16.msra.mxu1 %v4424_v61  ;;  %v685_v61 = vsel %vm4671_vm4, 0, %v684_v58  ;;  %v739_v11 = vsel %vm4677_vm5, 0, %v738_v10  ;;  %v697_v14 = vsel %vm4671_vm4, 0, %v696_v13  ;;  %749 = vst [vmem:[#allocation2 + $0x190] sm:$0x80] %v748_v16  ;;  %v4464_v15 = vld [vmem:[%s5845_s3 + $0x88] sm:$0xff]  }
  0x2d   : > { %4037 = vmatpush3.bf16.msra.mxu0 %v4423_v30  ;;  %3558 = vmatprep.subr.bf16.mxu1 %v4425_v62  ;;  %v712_v30 = vsel %vm4677_vm5, 0, %v711_v28  ;;  %686 = vst [vmem:[#allocation2 + $0x120] sm:$0x1] %v685_v61  ;;  %740 = vst [vmem:[#allocation2 + $0x148] sm:$0x80] %v739_v11 }
  0x2e   : > { %4007 = vmatmul.mubr.bf16.gmra.mrb[4].mxu0 %v315_v39  ;;  %4038 = vmatprep.subr.bf16.mxu0 %v4426_v63  ;;  %713 = vst [vmem:[#allocation2 + $0x70] sm:$0x80] %v712_v30  ;;  %v714_v39 = vld [vmem:[#allocation2 + $0x88] sm:$0x80]  ;;  %698 = vst [vmem:[#allocation2 + $0x180] sm:$0x1] %v697_v14 }
  0x2f   : > { %4010 = vmatprep.mubr.bf16.mxu0 %v316_v40  ;;  %4023 = vmatmul.mubr.bf16.gmra.mrb[4].mxu1 %v323_v41  ;;  %v664_v40 = vsel %vm4671_vm4, 0, %v663_v38  ;;  %v715_v41 = vsel %vm4677_vm5, 0, %v714_v39 }
  0x30   : > { %4026 = vmatprep.mubr.bf16.mxu1 %v324_v42  ;;  %3559 = vmatpush3.bf16.msra.mxu1 %v4427_v0  ;;  %665 = vst [vmem:[#allocation2 + $0x78] sm:$0x1] %v664_v40  ;;  %716 = vst [vmem:[#allocation2 + $0x88] sm:$0x80] %v715_v41  ;;  %v672_v42 = vld [vmem:[#allocation2 + $0xc0] sm:$0x1] }
  0x31   : > { %4039 = vmatpush3.bf16.msra.mxu0 %v4426_v63  ;;  %3560 = vmatprep.subr.bf16.mxu1 %v4428_v1  ;;  %v673_v44 = vsel %vm4671_vm4, 0, %v672_v42  ;;  %v681_v63 = vld [vmem:[#allocation2 + $0x108] sm:$0x1]  ;;  %v732_v0 = vld [vmem:[#allocation2 + $0x118] sm:$0x80] }
  0x32   : > { %4040 = vmatprep.subr.bf16.mxu0 %v4429_v2  ;;  %674 = vst [vmem:[#allocation2 + $0xc0] sm:$0x1] %v673_v44  ;;  %v682_v1 = vsel %vm4671_vm4, 0, %v681_v63 }
  0x33   : > { %683 = vst [vmem:[#allocation2 + $0x108] sm:$0x1] %v682_v1 }
  0x34   : > { %3561 = vmatpush3.bf16.msra.mxu1 %v4430_v3  ;;  %v690_v3 = vld [vmem:[#allocation2 + $0x150] sm:$0x1] }
  0x35   : > { %4041 = vmatpush3.bf16.msra.mxu0 %v4429_v2  ;;  %3562 = vmatprep.subr.bf16.mxu1 %v4431_v4  ;;  %v733_v2 = vsel %vm4677_vm5, 0, %v732_v0  ;;  %v741_v4 = vld [vmem:[#allocation2 + $0x160] sm:$0x80] }
  0x36   : > { %4011 = vmatmul.mubr.bf16.gmra.mrb[8].mxu0 %v317_v51  ;;  %4042 = vmatprep.subr.bf16.mxu0 %v4432_v5  ;;  %v729_v51 = vld [vmem:[#allocation2 + $0x100] sm:$0x80]  ;;  %734 = vst [vmem:[#allocation2 + $0x118] sm:$0x80] %v733_v2 }
  0x37   : > { %4014 = vmatprep.mubr.bf16.mxu0 %v318_v52  ;;  %4027 = vmatmul.mubr.bf16.gmra.mrb[8].mxu1 %v325_v53  ;;  %v679_v52 = vsel %vm4671_vm4, 0, %v678_v50  ;;  %v730_v53 = vsel %vm4677_vm5, 0, %v729_v51 }
  0x38   : > { %4030 = vmatprep.mubr.bf16.mxu1 %v326_v54  ;;  %3563 = vmatpush3.bf16.msra.mxu1 %v4433_v6  ;;  %v675_v54 = vld [vmem:[#allocation2 + $0xd8] sm:$0x1]  ;;  %680 = vst [vmem:[#allocation2 + $0xf0] sm:$0x1] %v679_v52  ;;  %731 = vst [vmem:[#allocation2 + $0x100] sm:$0x80] %v730_v53 }
  0x39   : > { %4043 = vmatpush3.bf16.msra.mxu0 %v4432_v5  ;;  %3564 = vmatprep.subr.bf16.mxu1 %v4434_v7  ;;  %v676_v56 = vsel %vm4671_vm4, 0, %v675_v54  ;;  %v687_v5 = vld [vmem:[#allocation2 + $0x138] sm:$0x1]  ;;  %v691_v6 = vsel %vm4671_vm4, 0, %v690_v3  ;;  %v742_v7 = vsel %vm4677_vm5, 0, %v741_v4 }
  0x3a   : > { %4044 = vmatprep.subr.bf16.mxu0 %v4435_v18  ;;  %677 = vst [vmem:[#allocation2 + $0xd8] sm:$0x1] %v676_v56  ;;  %v688_v9 = vsel %vm4671_vm4, 0, %v687_v5  ;;  %692 = vst [vmem:[#allocation2 + $0x150] sm:$0x1] %v691_v6 }
  0x3b   : > { %743 = vst [vmem:[#allocation2 + $0x160] sm:$0x80] %v742_v7  ;;  %689 = vst [vmem:[#allocation2 + $0x138] sm:$0x1] %v688_v9 }
  0x3c   : > { %3565 = vmatpush3.bf16.msra.mxu1 %v4436_v19  ;;  %v694_v19 = vsel %vm4671_vm4, 0, %v693_v17 }
  0x3d   : > { %4045 = vmatpush3.bf16.msra.mxu0 %v4435_v18  ;;  %3566 = vmatprep.subr.bf16.mxu1 %v4437_v20  ;;  %v744_v18 = vld [vmem:[#allocation2 + $0x178] sm:$0x80]  ;;  %695 = vst [vmem:[#allocation2 + $0x168] sm:$0x1] %v694_v19  ;;  %v900_v19 = vld [vmem:[#allocation2 + $0x30] sm:$0xff] }
  0x3e   : > { %4015 = vmatmul.mubr.bf16.gmra.mrb[12].mxu0 %v319_v59  ;;  %4046 = vmatprep.subr.bf16.mxu0 %v4438_v21  ;;  %v735_v59 = vld [vmem:[#allocation2 + $0x130] sm:$0x80]  ;;  %v745_v20 = vsel %vm4677_vm5, 0, %v744_v18 }
  0x3f   : > { %4031 = vmatmul.mubr.bf16.gmra.mrb[12].mxu1 %v327_v60  ;;  %v4443_v60 = vld [vmem:[%s5845_s3 + $0x40] sm:$0xff]   ;;  %v736_v62 = vsel %vm4677_vm5, 0, %v735_v59  ;;  %746 = vst [vmem:[#allocation2 + $0x178] sm:$0x80] %v745_v20 }
  0x40   : > { %3567 = vmatpush3.bf16.msra.mxu1 %v4439_v22  ;;  %737 = vst [vmem:[#allocation2 + $0x130] sm:$0x80] %v736_v62  ;;  %v4508_v22 = vmov 0  }
  0x41   : > { %4047 = vmatpush3.bf16.msra.mxu0 %v4438_v21  ;;  %3568 = vmatprep.subr.bf16.mxu1 %v4440_v23  ;;  %v4459_v21 = vld [vmem:[%s5845_s3 + $0x1c0] sm:$0xff]   ;;  %641 = vst [vmem:[#allocation2 + $0x8] sm:$0xff] %v4508_v22 }
  0x42   : > { %4048 = vmatprep.subr.bf16.mxu0 %v4441_v24  ;;  %v4777_v23 = vld [vmem:[%s5844_s2] ss:$0 sm:$0xff] }
  0x44   : > { %3569 = vmatpush3.bf16.msra.mxu1 %v4442_v25 }
  0x45   : > { %4049 = vmatpush3.bf16.msra.mxu0 %v4441_v24  ;;  %3826 = vmatprep.subr.bf16.mxu1 %v4459_v21  ;;  %v998_v21 = vld [vmem:[#allocation2 + $0x40] sm:$0xff] }
  0x46   : > { %3690 = vmatprep.subr.bf16.mxu0 %v4443_v60 }
  0xf9   : > { %v4004_v8 = vpop.f32.mrb[0].mxu0 }
  0xfa   : > { %v442_v24 = vadd.f32 %v4004_v8, %v4777_v23  ;;  %v433_v12 = vpop.f32.mrb[1].mxu0  ;;  %v4020_v25 = vpop.f32.mrb[0].mxu1 }
  0xfb   : > { %v434_v26 = vadd.f32 %v4777_v23, %v433_v12  ;;  %v4005_v27 = vpop.f32.mrb[2].mxu0  ;;  %v506_v28 = vadd.f32 %v4020_v25, %v4777_v23  ;;  %v497_v29 = vpop.f32.mrb[1].mxu1 }
  0xfc   : > { %v562_v30 = vmul.f32 0.01, %v442_v24  ;;  %v445_v31 = vadd.f32 %v4005_v27, %v4777_v23  ;;  %v436_v32 = vpop.f32.mrb[3].mxu0  ;;  %v4784_v33 = vadd.f32 %v4777_v23, %v497_v29  ;;  %v4021_v34 = vpop.f32.mrb[2].mxu1  ;;  %v995_v29 = vld [vmem:[#allocation2 + $0x28] sm:$0xff] }
  0xfd   : > { %v560_v35 = vmul.f32 0.01, %v434_v26  ;;  %v437_v36 = vadd.f32 %v4777_v23, %v436_v32  ;;  %v578_v37 = vmul.f32 0.01, %v506_v28  ;;  %v509_v38 = vadd.f32 %v4021_v34, %v4777_v23  ;;  %v500_v39 = vpop.f32.mrb[3].mxu1 }
  0xfe   : > { %v563_v40 = vmul.f32 0.01, %v445_v31  ;;  %v4789_v41 = vmul.f32 0.01, %v4784_v33  ;;  %v4792_v42 = vadd.f32 %v4777_v23, %v500_v39  ;;  %v594_v46 = vmax.f32 %v442_v24, %v562_v30 }
  0xff   : > { %v561_v43 = vmul.f32 0.01, %v437_v36  ;;  %v610_v44 = vmax.f32 %v506_v28, %v578_v37  ;;  %v579_v45 = vmul.f32 0.01, %v509_v38  ;;  %v592_v49 = vmax.f32 %v434_v26, %v560_v35  ;;  %v897_v28 = vld [vmem:[#allocation2 + $0x18] sm:$0xff] }
 0x100   : > { %v595_v47 = vmax.f32 %v445_v31, %v563_v40  ;;  %v4795_v48 = vmul.f32 0.01, %v4792_v42  ;;  %v608_v56 = vmax.f32 %v4784_v33, %v4789_v41 }
 0x101   : > { %v593_v50 = vmax.f32 %v437_v36, %v561_v43  ;;  %v4008_v51 = vpop.f32.mrb[4].mxu0  ;;  %v611_v52 = vmax.f32 %v509_v38, %v579_v45  ;;  %v4444_v45 = vld [vmem:[%s5845_s3] sm:$0xff]  }
 0x102   : > { %v4797_v53 = vpack.c.bf16 %v595_v47, %v594_v46  ;;  %v458_v54 = vadd.f32 %v4008_v51, %v4777_v23  ;;  %v449_v55 = vpop.f32.mrb[5].mxu0  ;;  %v609_v57 = vmax.f32 %v4792_v42, %v4795_v48  ;;  %v4024_v58 = vpop.f32.mrb[4].mxu1  ;;  %v4460_v47 = vld [vmem:[%s5845_s3 + $0x180] sm:$0xff]  }
 0x103   : > { %v624_v59 = vpack.c.bf16 %v593_v50, %v592_v49  ;;  %v450_v60 = vadd.f32 %v4777_v23, %v449_v55  ;;  %v4009_v61 = vpop.f32.mrb[6].mxu0  ;;  %v4805_v62 = vpack.c.bf16 %v611_v52, %v610_v44  ;;  %v4808_v63 = vadd.f32 %v4024_v58, %v4777_v23  ;;  %v4810_v0 = vpop.f32.mrb[5].mxu1  ;;  %v4445_v55 = vld [vmem:[%s5845_s3 + $0x48] sm:$0xff]   ;;  %v918_v48 = vld [vmem:[#allocation2 + $0xc0] sm:$0xff] }
 0x104   : > { %751 = vst [vmem:[#allocation2 + $0x38] sm:$0xff] %v4797_v53  ;;  %v774_v1 = vshrl.u32 %v4797_v53, 16  ;;  %v777_v2 = vshll.u32 %v4797_v53, 16  ;;  %v566_v3 = vmul.f32 0.01, %v458_v54  ;;  %v461_v4 = vadd.f32 %v4009_v61, %v4777_v23  ;;  %v452_v5 = vpop.f32.mrb[7].mxu0 }
 0x105   : > { %v4816_v6 = vpop.f32.mrb[6].mxu1  ;;  %750 = vst [vmem:[#allocation2 + $0x20] sm:$0xff] %v624_v59  ;;  %v767_v7 = vshrl.u32 %v624_v59, 16  ;;  %v770_v9 = vshll.u32 %v624_v59, 16  ;;  %v564_v10 = vmul.f32 0.01, %v450_v60  ;;  %v453_v11 = vadd.f32 %v4777_v23, %v452_v5  ;;  %1412 = vmatprep.mubr.bf16.mxu1 %v624_v59 }
 0x106   : > { %759 = vst [vmem:[#allocation2 + $0xf8] sm:$0xff] %v4805_v62  ;;  %v4820_v13 = vpop.f32.mrb[7].mxu1  ;;  %v776_v14 = vrot.slane %v774_v1, 7  ;;  %v947_v16 = vrot.slane %v777_v2, 1  ;;  %v598_v17 = vmax.f32 %v458_v54, %v566_v3  ;;  %v567_v18 = vmul.f32 0.01, %v461_v4 }
 0x107   : > { %v769_v8 = vrot.slane %v767_v7, 7  ;;  %v945_v24 = vrot.slane %v770_v9, 1  ;;  %v596_v12 = vmax.f32 %v450_v60, %v564_v10  ;;  %v565_v25 = vmul.f32 0.01, %v453_v11  ;;  %v4462_v59 = vld [vmem:[%s5845_s3 + $0x1c8] sm:$0xff]  }
 0x108   : > { %v779_v26 = vor.u32 %v777_v2, %v776_v14  ;;  %v948_v27 = vor.u32 %v947_v16, %v774_v1  ;;  %v599_v30 = vmax.f32 %v461_v4, %v567_v18  ;;  %v830_v31 = vshrl.u32 %v4805_v62, 16  ;;  %v906_v16 = vld [vmem:[#allocation2 + $0x60] sm:$0xff] }
 0x109   : > { %v772_v32 = vor.u32 %v770_v9, %v769_v8  ;;  %v946_v34 = vor.u32 %v945_v24, %v767_v7  ;;  %v597_v35 = vmax.f32 %v453_v11, %v565_v25  ;;  %v4012_v36 = vpop.f32.mrb[8].mxu0  ;;  %v833_v37 = vshll.u32 %v4805_v62, 16  ;;  %v1004_v8 = vld [vmem:[#allocation2 + $0x70] sm:$0xff] }
 0x10a   : > { %v4838_v38 = vsel %vm4824_vm9, %v779_v26, %v900_v19  ;;  %v999_v39 = vsel %vm4830_vm10, %v948_v27, %v998_v21  ;;  %v4842_v40 = vpack.c.bf16 %v599_v30, %v598_v17  ;;  %v4845_v43 = vadd.f32 %v4012_v36, %v4777_v23  ;;  %v465_v44 = vpop.f32.mrb[9].mxu0  ;;  %v4850_v46 = vpop.f32.mrb[8].mxu1  ;;  %v4446_v21 = vld [vmem:[%s5845_s3 + $0x8] sm:$0xff]   ;;  %v4447_v26 = vld [vmem:[%s5845_s3 + $0x50] sm:$0xff]   ;;  %v1001_v30 = vld [vmem:[#allocation2 + $0x58] sm:$0xff] }
 0x10b   : > { %902 = vst [vmem:[#allocation2 + $0x30] sm:$0xff] %v4838_v38  ;;  %1000 = vst [vmem:[#allocation2 + $0x40] sm:$0xff] %v999_v39  ;;  %v898_v49 = vsel %vm4824_vm9, %v772_v32, %v897_v28  ;;  %v996_v50 = vsel %vm4830_vm10, %v946_v34, %v995_v29  ;;  %v4860_v51 = vpack.c.bf16 %v597_v35, %v596_v12  ;;  %v4013_v54 = vpop.f32.mrb[10].mxu0  ;;  %v4868_v58 = vpop.f32.mrb[9].mxu1  ;;  %v903_v29 = vld [vmem:[#allocation2 + $0x48] sm:$0xff]  ;;  %v4898_v34 = vrot.slane %v830_v31, 7 }
 0x10c   : > { %v4863_v52 = vadd.f32 %v4777_v23, %v465_v44  ;;  %899 = vst [vmem:[#allocation2 + $0x18] sm:$0xff] %v898_v49  ;;  %997 = vst [vmem:[#allocation2 + $0x28] sm:$0xff] %v996_v50  ;;  %v788_v60 = vshrl.u32 %v4842_v40, 16  ;;  %v791_v61 = vshll.u32 %v4842_v40, 16  ;;  %v570_v1 = vmul.f32 0.01, %v4845_v43  ;;  %1413 = vmatmul.mubr.bf16.vlgmr.msra.gmra.mrb[16].mxu1 %v898_v49  ;;  %4050 = vmatprep.mubr.bf16.mxu0 %v996_v50 }
 0x10d   : > { %753 = vst [vmem:[#allocation2 + $0x68] sm:$0xff] %v4842_v40  ;;  %v477_v2 = vadd.f32 %v4013_v54, %v4777_v23  ;;  %v468_v3 = vpop.f32.mrb[11].mxu0  ;;  %v4878_v4 = vpop.f32.mrb[10].mxu1  ;;  %752 = vst [vmem:[#allocation2 + $0x50] sm:$0xff] %v4860_v51  ;;  %v781_v5 = vshrl.u32 %v4860_v51, 16  ;;  %v784_v7 = vshll.u32 %v4860_v51, 16  ;;  %1420 = vmatprep.mubr.bf16.mxu1 %v4797_v53  ;;  %4051 = vmatmul.mubr.bf16.vlgmr.msra.gmra.mrb[16].mxu0 %v999_v39 }
 0x10e   : > { %v568_v9 = vmul.f32 0.01, %v4863_v52  ;;  %v469_v10 = vadd.f32 %v4777_v23, %v468_v3  ;;  %v4886_v11 = vpop.f32.mrb[11].mxu1  ;;  %v790_v14 = vrot.slane %v788_v60, 7  ;;  %v951_v17 = vrot.slane %v791_v61, 1  ;;  %3691 = vmatpush3.bf16.msra.mxu0 %v4444_v45  ;;  %3827 = vmatpush3.bf16.msra.mxu1 %v4460_v47  ;;  %v4448_v54 = vld [vmem:[%s5845_s3 + $0x10] sm:$0xff]  }
 0x10f   : > { %v602_v18 = vmax.f32 %v4845_v43, %v570_v1  ;;  %v571_v19 = vmul.f32 0.01, %v477_v2  ;;  %v783_v24 = vrot.slane %v781_v5, 7  ;;  %v949_v12 = vrot.slane %v784_v7, 1  ;;  %3692 = vmatprep.subr.bf16.mxu0 %v4445_v55  ;;  %3828 = vmatprep.subr.bf16.mxu1 %v4462_v59  ;;  %v4463_v59 = vld [vmem:[%s5845_s3 + $0x188] sm:$0xff]   ;;  %v1047_v20 = vld [vmem:[#allocation2 + $0x20] sm:$0xff] }
 0x110   : > { %v600_v53 = vmax.f32 %v4863_v52, %v568_v9  ;;  %v569_v25 = vmul.f32 0.01, %v469_v10  ;;  %v793_v27 = vor.u32 %v791_v61, %v790_v14  ;;  %v952_v28 = vor.u32 %v951_v17, %v788_v60  ;;  %v4465_v9 = vld [vmem:[%s5845_s3 + $0x1d0] sm:$0xff]  }
 0x111   : > { %v603_v32 = vmax.f32 %v477_v2, %v571_v19  ;;  %v786_v35 = vor.u32 %v784_v7, %v783_v24  ;;  %v950_v36 = vor.u32 %v949_v12, %v781_v5  ;;  %v4016_v43 = vpop.f32.mrb[12].mxu0  ;;  %v4902_v44 = vrot.slane %v833_v37, 1  ;;  %v4449_v7 = vld [vmem:[%s5845_s3 + $0x58] sm:$0xff]  }
 0x112   : > { %v601_v39 = vmax.f32 %v469_v10, %v569_v25  ;;  %v4906_v45 = vsel %vm4824_vm9, %v793_v27, %v906_v16  ;;  %v1005_v47 = vsel %vm4830_vm10, %v952_v28, %v1004_v8  ;;  %v4913_v50 = vadd.f32 %v4016_v43, %v4777_v23  ;;  %v481_v52 = vpop.f32.mrb[13].mxu0  ;;  %3693 = vmatpush3.bf16.msra.mxu0 %v4446_v21  ;;  %v4918_v55 = vpop.f32.mrb[12].mxu1  ;;  %v912_v21 = vld [vmem:[#allocation2 + $0x90] sm:$0xff]  ;;  %v1010_v27 = vld [vmem:[#allocation2 + $0xa0] sm:$0xff] }
 0x113   : > { %v4910_v49 = vpack.c.bf16 %v603_v32, %v602_v18  ;;  %908 = vst [vmem:[#allocation2 + $0x60] sm:$0xff] %v4906_v45  ;;  %1006 = vst [vmem:[#allocation2 + $0x70] sm:$0xff] %v1005_v47  ;;  %v4926_v60 = vsel %vm4824_vm9, %v786_v35, %v903_v29  ;;  %v1002_v61 = vsel %vm4830_vm10, %v950_v36, %v1001_v30  ;;  %v4017_v3 = vpop.f32.mrb[14].mxu0  ;;  %3694 = vmatprep.subr.bf16.mxu0 %v4447_v26  ;;  %v4935_v5 = vpop.f32.mrb[13].mxu1  ;;  %v4450_v30 = vld [vmem:[%s5845_s3 + $0x18] sm:$0xff]   ;;  %v4451_v43 = vld [vmem:[%s5845_s3 + $0x60] sm:$0xff]  }
 0x114   : > { %v4930_v1 = vpack.c.bf16 %v601_v39, %v600_v53  ;;  %v4933_v2 = vadd.f32 %v4777_v23, %v481_v52  ;;  %905 = vst [vmem:[#allocation2 + $0x48] sm:$0xff] %v4926_v60  ;;  %1003 = vst [vmem:[#allocation2 + $0x58] sm:$0xff] %v1002_v61  ;;  %v574_v16 = vmul.f32 0.01, %v4913_v50  ;;  %v493_v17 = vadd.f32 %v4017_v3, %v4777_v23  ;;  %v484_v18 = vpop.f32.mrb[15].mxu0  ;;  %v4950_v19 = vpop.f32.mrb[14].mxu1 }
 0x115   : > { %755 = vst [vmem:[#allocation2 + $0x98] sm:$0xff] %v4910_v49  ;;  %v802_v10 = vshrl.u32 %v4910_v49, 16  ;;  %v805_v14 = vshll.u32 %v4910_v49, 16  ;;  %1421 = vmatmul.mubr.bf16.gmra.mrb[20].mxu1 %v4838_v38  ;;  %4054 = vmatprep.mubr.bf16.mxu0 %v1002_v61  ;;  %v485_v53 = vadd.f32 %v4777_v23, %v484_v18  ;;  %v4958_v25 = vpop.f32.mrb[15].mxu1  ;;  %v924_v39 = vld [vmem:[#allocation2 + $0xf0] sm:$0xff]  ;;  %v909_v52 = vld [vmem:[#allocation2 + $0x78] sm:$0xff]  ;;  %v5034_v33 = vadd.f32 %v4777_v23, %v4810_v0 }
 0x116   : > { %754 = vst [vmem:[#allocation2 + $0x80] sm:$0xff] %v4930_v1  ;;  %v795_v8 = vshrl.u32 %v4930_v1, 16  ;;  %v798_v24 = vshll.u32 %v4930_v1, 16  ;;  %v572_v12 = vmul.f32 0.01, %v4933_v2  ;;  %1428 = vmatprep.mubr.bf16.mxu1 %v4860_v51  ;;  %4055 = vmatmul.mubr.bf16.gmra.mrb[20].mxu0 %v1005_v47  ;;  %v606_v28 = vmax.f32 %v4913_v50, %v574_v16  ;;  %v1022_v3 = vld [vmem:[#allocation2 + $0x100] sm:$0xff] }
 0x117   : > { %v804_v38 = vrot.slane %v802_v10, 7  ;;  %v955_v26 = vrot.slane %v805_v14, 1  ;;  %v575_v29 = vmul.f32 0.01, %v493_v17  ;;  %3695 = vmatpush3.bf16.msra.mxu0 %v4448_v54  ;;  %3829 = vmatpush3.bf16.msra.mxu1 %v4463_v59  ;;  %v573_v51 = vmul.f32 0.01, %v485_v53 }
 0x118   : > { %v797_v32 = vrot.slane %v795_v8, 7  ;;  %v953_v35 = vrot.slane %v798_v24, 1  ;;  %v604_v36 = vmax.f32 %v4933_v2, %v572_v12  ;;  %3696 = vmatprep.subr.bf16.mxu0 %v4449_v7  ;;  %3830 = vmatprep.subr.bf16.mxu1 %v4465_v9  ;;  %v1007_v54 = vld [vmem:[#allocation2 + $0x88] sm:$0xff]  ;;  %v835_v59 = vor.u32 %v833_v37, %v4898_v34  ;;  %v4452_v34 = vld [vmem:[%s5845_s3 + $0x20] sm:$0xff]   ;;  %v4468_v12 = vld [vmem:[%s5845_s3 + $0x1d8] sm:$0xff]  }
 0x119   : > { %v807_v47 = vor.u32 %v805_v14, %v804_v38  ;;  %v956_v50 = vor.u32 %v955_v26, %v802_v10  ;;  %v607_v61 = vmax.f32 %v493_v17, %v575_v29  ;;  %v605_v18 = vmax.f32 %v485_v53, %v573_v51  ;;  %v4454_v0 = vld [vmem:[%s5845_s3 + $0x28] sm:$0xff]  }
 0x11a   : > { %v800_v16 = vor.u32 %v798_v24, %v797_v32  ;;  %v954_v2 = vor.u32 %v953_v35, %v795_v8  ;;  %v964_v7 = vor.u32 %v4902_v44, %v830_v31  ;;  %v4984_v37 = vsel %vm4824_vm9, %v835_v59, %v924_v39  ;;  %v4466_v31 = vld [vmem:[%s5845_s3 + $0x190] sm:$0xff]   ;;  %v4453_v24 = vld [vmem:[%s5845_s3 + $0x68] sm:$0xff]   ;;  %v921_v59 = vld [vmem:[#allocation2 + $0xd8] sm:$0xff] }
 0x11b   : > { %v4976_v9 = vsel %vm4824_vm9, %v807_v47, %v912_v21  ;;  %v1011_v10 = vsel %vm4830_vm10, %v956_v50, %v1010_v27  ;;  %v4980_v14 = vpack.c.bf16 %v607_v61, %v606_v28  ;;  %3697 = vmatpush3.bf16.msra.mxu0 %v4450_v30  ;;  %v4999_v21 = vpack.c.bf16 %v605_v18, %v604_v36  ;;  %v1016_v30 = vld [vmem:[#allocation2 + $0xd0] sm:$0xff]  ;;  %v1013_v47 = vld [vmem:[#allocation2 + $0xb8] sm:$0xff] }
 0x11c   : > { %914 = vst [vmem:[#allocation2 + $0x90] sm:$0xff] %v4976_v9  ;;  %1012 = vst [vmem:[#allocation2 + $0xa0] sm:$0xff] %v1011_v10  ;;  %v4995_v44 = vsel %vm4824_vm9, %v800_v16, %v909_v52  ;;  %v1008_v17 = vsel %vm4830_vm10, %v954_v2, %v1007_v54  ;;  %v5004_v8 = vsel %vm4830_vm10, %v964_v7, %v1022_v3  ;;  %3698 = vmatprep.subr.bf16.mxu0 %v4451_v43  ;;  %v4455_v36 = vld [vmem:[%s5845_s3 + $0x70] sm:$0xff]   ;;  %v915_v43 = vld [vmem:[#allocation2 + $0xa8] sm:$0xff] }
 0x11d   : > { %926 = vst [vmem:[#allocation2 + $0xf0] sm:$0xff] %v4984_v37  ;;  %911 = vst [vmem:[#allocation2 + $0x78] sm:$0xff] %v4995_v44  ;;  %v816_v53 = vshrl.u32 %v4980_v14, 16  ;;  %v819_v38 = vshll.u32 %v4980_v14, 16  ;;  %v5023_v26 = vpack.c.bf16 %v609_v57, %v608_v56  ;;  %v5026_v27 = vmul.f32 0.01, %v4808_v63  ;;  %1429 = vmatmul.mubr.bf16.gmra.mrb[24].mxu1 %v4926_v60  ;;  %4058 = vmatprep.mubr.bf16.mxu0 %v1008_v17 }
 0x11e   : > { %1009 = vst [vmem:[#allocation2 + $0x88] sm:$0xff] %v1008_v17  ;;  %757 = vst [vmem:[#allocation2 + $0xc8] sm:$0xff] %v4980_v14  ;;  %v809_v28 = vshrl.u32 %v4999_v21, 16  ;;  %v812_v29 = vshll.u32 %v4999_v21, 16  ;;  %v525_v41 = vadd.f32 %v4816_v6, %v4777_v23  ;;  %1436 = vmatprep.mubr.bf16.mxu1 %v4842_v40  ;;  %4059 = vmatmul.mubr.bf16.gmra.mrb[24].mxu0 %v1011_v10  ;;  %v5048_v35 = vmul.f32 0.01, %v5034_v33 }
 0x11f   : > { %1024 = vst [vmem:[#allocation2 + $0x100] sm:$0xff] %v5004_v8  ;;  %756 = vst [vmem:[#allocation2 + $0xb0] sm:$0xff] %v4999_v21  ;;  %v818_v42 = vrot.slane %v816_v53, 7  ;;  %v959_v56 = vrot.slane %v819_v38, 1  ;;  %v823_v57 = vshrl.u32 %v5023_v26, 16  ;;  %v826_v60 = vshll.u32 %v5023_v26, 16  ;;  %3699 = vmatpush3.bf16.msra.mxu0 %v4452_v34  ;;  %3831 = vmatpush3.bf16.msra.mxu1 %v4466_v31 }
 0x120   : > { %758 = vst [vmem:[#allocation2 + $0xe0] sm:$0xff] %v5023_v26  ;;  %v811_v6 = vrot.slane %v809_v28, 7  ;;  %v957_v32 = vrot.slane %v812_v29, 1  ;;  %v614_v40 = vmax.f32 %v4808_v63, %v5026_v27  ;;  %3700 = vmatprep.subr.bf16.mxu0 %v4453_v24  ;;  %3832 = vmatprep.subr.bf16.mxu1 %v4468_v12  ;;  %v1019_v3 = vld [vmem:[#allocation2 + $0xe8] sm:$0xff]  ;;  %v612_v63 = vmax.f32 %v5034_v33, %v5048_v35  ;;  %v4469_v34 = vld [vmem:[%s5845_s3 + $0x198] sm:$0xff]   ;;  %v4471_v33 = vld [vmem:[%s5845_s3 + $0x1e0] sm:$0xff]  }
 0x121   : > { %v821_v51 = vor.u32 %v819_v38, %v818_v42  ;;  %v960_v39 = vor.u32 %v959_v56, %v816_v53  ;;  %v825_v50 = vrot.slane %v823_v57, 7  ;;  %v961_v52 = vrot.slane %v826_v60, 1  ;;  %v4456_v53 = vld [vmem:[%s5845_s3 + $0x30] sm:$0xff]   ;;  %v5126_v35 = vld [vmem:[%s5845_s3 + $0x80] sm:$0xff]  }
 0x122   : > { %v814_v54 = vor.u32 %v812_v29, %v811_v6  ;;  %v958_v61 = vor.u32 %v957_v32, %v809_v28  ;;  %v583_v16 = vmul.f32 0.01, %v525_v41  ;;  %v517_v12 = vadd.f32 %v4777_v23, %v4820_v13  ;;  %v4457_v29 = vld [vmem:[%s5845_s3 + $0x78] sm:$0xff]  }
 0x123   : > { %v5057_v2 = vsel %vm4824_vm9, %v821_v51, %v918_v48  ;;  %v1017_v18 = vsel %vm4830_vm10, %v960_v39, %v1016_v30  ;;  %v828_v7 = vor.u32 %v826_v60, %v825_v50  ;;  %v962_v10 = vor.u32 %v961_v52, %v823_v57  ;;  %3701 = vmatpush3.bf16.msra.mxu0 %v4454_v0  ;;  %v1028_v50 = vld [vmem:[#allocation2 + $0x130] sm:$0xff] }
 0x124   : > { %920 = vst [vmem:[#allocation2 + $0xc0] sm:$0xff] %v5057_v2  ;;  %1018 = vst [vmem:[#allocation2 + $0xd0] sm:$0xff] %v1017_v18  ;;  %v5067_v31 = vsel %vm4824_vm9, %v814_v54, %v915_v43  ;;  %v1014_v17 = vsel %vm4830_vm10, %v958_v61, %v1013_v47  ;;  %v615_v24 = vmax.f32 %v525_v41, %v583_v16  ;;  %3702 = vmatprep.subr.bf16.mxu0 %v4455_v36  ;;  %v930_v47 = vld [vmem:[#allocation2 + $0x120] sm:$0xff] }
 0x125   : > { %917 = vst [vmem:[#allocation2 + $0xa8] sm:$0xff] %v5067_v31  ;;  %1015 = vst [vmem:[#allocation2 + $0xb8] sm:$0xff] %v1014_v17  ;;  %v5079_v38 = vsel %vm4824_vm9, %v828_v7, %v921_v59  ;;  %v1020_v27 = vsel %vm4830_vm10, %v962_v10, %v1019_v3  ;;  %v538_v28 = vadd.f32 %v4850_v46, %v4777_v23  ;;  %1437 = vmatmul.mubr.bf16.gmra.mrb[28].mxu1 %v4906_v45  ;;  %v4474_v3 = vld [vmem:[%s5845_s3 + $0x1a8] sm:$0xff]   ;;  %v4475_v10 = vld [vmem:[%s5845_s3 + $0x1f0] sm:$0xff]  }
 0x126   : > { %v530_v13 = vadd.f32 %v4777_v23, %v4868_v58  ;;  %923 = vst [vmem:[#allocation2 + $0xd8] sm:$0xff] %v5079_v38  ;;  %1021 = vst [vmem:[#allocation2 + $0xe8] sm:$0xff] %v1020_v27  ;;  %v5095_v41 = vpack.c.bf16 %v615_v24, %v614_v40  ;;  %v581_v42 = vmul.f32 0.01, %v517_v12  ;;  %v541_v46 = vadd.f32 %v4878_v4, %v4777_v23  ;;  %v4472_v4 = vld [vmem:[%s5845_s3 + $0x1a0] sm:$0xff]  }
 0x127   : > { %v533_v58 = vadd.f32 %v4777_v23, %v4886_v11  ;;  %4062 = vmatprep.mubr.bf16.mxu0 %v1014_v17  ;;  %1444 = vmatprep.mubr.bf16.mxu1 %v4930_v1  ;;  %v586_v45 = vmul.f32 0.01, %v538_v28  ;;  %v5104_v56 = vadd.f32 %v4918_v55, %v4777_v23  ;;  %v5108_v57 = vadd.f32 %v4777_v23, %v4935_v5  ;;  %v4458_v55 = vld [vmem:[%s5845_s3 + $0x38] sm:$0xff]   ;;  %v4473_v5 = vld [vmem:[%s5845_s3 + $0x1e8] sm:$0xff]  }
 0x128   : > { %v584_v48 = vmul.f32 0.01, %v530_v13  ;;  %4063 = vmatmul.mubr.bf16.gmra.mrb[28].mxu0 %v1017_v18  ;;  %3833 = vmatpush3.bf16.msra.mxu1 %v4469_v34  ;;  %761 = vst [vmem:[#allocation2 + $0x128] sm:$0xff] %v5095_v41  ;;  %v844_v11 = vshrl.u32 %v5095_v41, 16  ;;  %v847_v1 = vshll.u32 %v5095_v41, 16  ;;  %v613_v60 = vmax.f32 %v517_v12, %v581_v42 }
 0x129   : > { %v587_v0 = vmul.f32 0.01, %v541_v46  ;;  %4066 = vmatprep.mubr.bf16.mxu0 %v1020_v27  ;;  %3703 = vmatpush3.bf16.msra.mxu0 %v4456_v53  ;;  %v618_v30 = vmax.f32 %v538_v28, %v586_v45  ;;  %v585_v32 = vmul.f32 0.01, %v533_v58  ;;  %v590_v40 = vmul.f32 0.01, %v5104_v56 }
 0x12a   : > { %v616_v6 = vmax.f32 %v530_v13, %v584_v48  ;;  %3704 = vmatprep.subr.bf16.mxu0 %v4457_v29  ;;  %3834 = vmatprep.subr.bf16.mxu1 %v4471_v33  ;;  %v846_v36 = vrot.slane %v844_v11, 7  ;;  %v967_v51 = vrot.slane %v847_v1, 1  ;;  %v5128_v39 = vpack.c.bf16 %v613_v60, %v612_v63  ;;  %v927_v13 = vld [vmem:[#allocation2 + $0x108] sm:$0xff]  ;;  %v1025_v29 = vld [vmem:[#allocation2 + $0x118] sm:$0xff] }
 0x12b   : > { %v619_v43 = vmax.f32 %v541_v46, %v587_v0  ;;  %v617_v52 = vmax.f32 %v533_v58, %v585_v32  ;;  %v622_v54 = vmax.f32 %v5104_v56, %v590_v40  ;;  %v5132_v61 = vmul.f32 0.01, %v5108_v57  ;;  %v4476_v56 = vld [vmem:[%s5845_s3 + $0x1b0] sm:$0xff]  }
 0x12c   : > { %v557_v59 = vadd.f32 %v4950_v19, %v4777_v23  ;;  %3835 = vmatpush3.bf16.msra.mxu1 %v4472_v4  ;;  %v849_v16 = vor.u32 %v847_v1, %v846_v36  ;;  %v968_v63 = vor.u32 %v967_v51, %v844_v11  ;;  %v837_v18 = vshrl.u32 %v5128_v39, 16  ;;  %v936_v4 = vld [vmem:[#allocation2 + $0x150] sm:$0xff]  ;;  %v1034_v1 = vld [vmem:[#allocation2 + $0x160] sm:$0xff] }
 0x12d   : > { %v840_v7 = vshll.u32 %v5128_v39, 16  ;;  %3705 = vmatpush3.bf16.msra.mxu0 %v4458_v55  ;;  %3836 = vmatprep.subr.bf16.mxu1 %v4473_v5  ;;  %v5144_v34 = vpack.c.bf16 %v619_v43, %v618_v30  ;;  %v5146_v19 = vpack.c.bf16 %v617_v52, %v616_v6  ;;  %v620_v17 = vmax.f32 %v5108_v57, %v5132_v61  ;;  %v933_v5 = vld [vmem:[#allocation2 + $0x138] sm:$0xff] }
 0x12e   : > { %v591_v24 = vmul.f32 0.01, %v557_v59  ;;  %1445 = vmatmul.mubr.bf16.gmra.mrb[32].mxu1 %v4995_v44  ;;  %4082 = vmatprep.subr.bf16.mxu0 %v5126_v35  ;;  %v5154_v12 = vsel %vm4824_vm9, %v849_v16, %v930_v47  ;;  %v1029_v53 = vsel %vm4830_vm10, %v968_v63, %v1028_v50  ;;  %v839_v27 = vrot.slane %v837_v18, 7  ;;  %v4477_v6 = vld [vmem:[%s5845_s3 + $0x1f8] sm:$0xff]  }
 0x12f   : > { %v965_v28 = vrot.slane %v840_v7, 1  ;;  %1452 = vmatprep.mubr.bf16.mxu1 %v4910_v49  ;;  %932 = vst [vmem:[#allocation2 + $0x120] sm:$0xff] %v5154_v12  ;;  %1030 = vst [vmem:[#allocation2 + $0x130] sm:$0xff] %v1029_v53  ;;  %v858_v44 = vshrl.u32 %v5144_v34, 16  ;;  %v861_v33 = vshll.u32 %v5144_v34, 16  ;;  %v851_v42 = vshrl.u32 %v5146_v19, 16 }
 0x130   : > { %v854_v46 = vshll.u32 %v5146_v19, 16  ;;  %4067 = vmatmul.mubr.bf16.gmra.mrb[32].mxu0 %v5004_v8  ;;  %3837 = vmatpush3.bf16.msra.mxu1 %v4474_v3  ;;  %v842_v58 = vor.u32 %v840_v7, %v839_v27  ;;  %v623_v48 = vmax.f32 %v557_v59, %v591_v24  ;;  %v549_v49 = vadd.f32 %v4777_v23, %v4958_v25  ;;  %v1031_v23 = vld [vmem:[#allocation2 + $0x148] sm:$0xff]  ;;  %v4478_v52 = vld [vmem:[%s5845_s3 + $0x1b8] sm:$0xff]   ;;  %v942_v7 = vld [vmem:[#allocation2 + $0x180] sm:$0xff] }
 0x131   : > { %v966_v45 = vor.u32 %v965_v28, %v837_v18  ;;  %3838 = vmatprep.subr.bf16.mxu1 %v4475_v10  ;;  %v860_v57 = vrot.slane %v858_v44, 7  ;;  %v971_v11 = vrot.slane %v861_v33, 1  ;;  %v853_v60 = vrot.slane %v851_v42, 7  ;;  %v1040_v10 = vld [vmem:[#allocation2 + $0x190] sm:$0xff] }
 0x132   : > { %v969_v0 = vrot.slane %v854_v46, 1  ;;  %v5172_v8 = vsel %vm4824_vm9, %v842_v58, %v927_v13  ;;  %v5176_v25 = vpack.c.bf16 %v623_v48, %v622_v54  ;;  %v589_v30 = vmul.f32 0.01, %v549_v49  ;;  %v1050_v48 = vld [vmem:[#allocation2 + $0x38] sm:$0xff] }
 0x133   : > { %v1026_v55 = vsel %vm4830_vm10, %v966_v45, %v1025_v29  ;;  %929 = vst [vmem:[#allocation2 + $0x108] sm:$0xff] %v5172_v8  ;;  %v863_v32 = vor.u32 %v861_v33, %v860_v57  ;;  %v972_v40 = vor.u32 %v971_v11, %v858_v44  ;;  %v856_v36 = vor.u32 %v854_v46, %v853_v60  ;;  %v1037_v33 = vld [vmem:[#allocation2 + $0x178] sm:$0xff]  ;;  %v1053_v57 = vld [vmem:[#allocation2 + $0x50] sm:$0xff]  ;;  %v1056_v60 = vld [vmem:[#allocation2 + $0x68] sm:$0xff] }
 0x134   : > { %1027 = vst [vmem:[#allocation2 + $0x118] sm:$0xff] %v1026_v55  ;;  %v970_v51 = vor.u32 %v969_v0, %v851_v42  ;;  %4070 = vmatprep.mubr.bf16.mxu0 %v1026_v55  ;;  %v872_v43 = vshrl.u32 %v5176_v25, 16  ;;  %v875_v47 = vshll.u32 %v5176_v25, 16  ;;  %v621_v50 = vmax.f32 %v549_v49, %v589_v30  ;;  %3839 = vmatpush3.bf16.msra.mxu1 %v4476_v56  ;;  %v4480_v49 = vld [vmem:[%s5845_s3 + $0xa8] sm:$0xff]   ;;  %v1049_v56 = vld [vmem:[#allocation2 + $0x30] sm:$0xff]  ;;  %v4482_v11 = vld [vmem:[%s5845_s3 + $0xb8] sm:$0xff]  }
 0x135   : > { %v5189_v54 = vsel %vm4824_vm9, %v863_v32, %v936_v4  ;;  %v1035_v61 = vsel %vm4830_vm10, %v972_v40, %v1034_v1  ;;  %v5195_v59 = vsel %vm4824_vm9, %v856_v36, %v933_v5  ;;  %3840 = vmatprep.subr.bf16.mxu1 %v4477_v6  ;;  %v4481_v4 = vld [vmem:[%s5845_s3 + $0xb0] sm:$0xff]   ;;  %v1052_v1 = vld [vmem:[#allocation2 + $0x48] sm:$0xff]  ;;  %v5268_v0 = vld [vmem:[%s5845_s3 + $0x200] sm:$0xff]  }
 0x136   : > { %v5199_v3 = vsel %vm4830_vm10, %v970_v51, %v1031_v23  ;;  %1453 = vmatmul.mubr.bf16.gmra.mrb[36].mxu1 %v4976_v9  ;;  %938 = vst [vmem:[#allocation2 + $0x150] sm:$0xff] %v5189_v54  ;;  %1036 = vst [vmem:[#allocation2 + $0x160] sm:$0xff] %v1035_v61  ;;  %v874_v16 = vrot.slane %v872_v43, 7  ;;  %v975_v63 = vrot.slane %v875_v47, 1  ;;  %v5205_v18 = vpack.c.bf16 %v621_v50, %v620_v17  ;;  %v1055_v55 = vld [vmem:[#allocation2 + $0x60] sm:$0xff]  ;;  %v1058_v23 = vld [vmem:[#allocation2 + $0x78] sm:$0xff] }
 0x137   : > { %935 = vst [vmem:[#allocation2 + $0x138] sm:$0xff] %v5195_v59  ;;  %1033 = vst [vmem:[#allocation2 + $0x148] sm:$0xff] %v5199_v3  ;;  %1460 = vmatprep.mubr.bf16.mxu1 %v4999_v21  ;;  %v1059_v5 = vld [vmem:[#allocation2 + $0x80] sm:$0xff]  ;;  %v1062_v30 = vld [vmem:[#allocation2 + $0x98] sm:$0xff] }
 0x138   : > { %4071 = vmatmul.mubr.bf16.gmra.mrb[36].mxu0 %v1029_v53  ;;  %v877_v24 = vor.u32 %v875_v47, %v874_v16  ;;  %v976_v27 = vor.u32 %v975_v63, %v872_v43  ;;  %v865_v9 = vshrl.u32 %v5205_v18, 16  ;;  %v868_v28 = vshll.u32 %v5205_v18, 16  ;;  %3841 = vmatpush3.bf16.msra.mxu1 %v4478_v52  ;;  %v939_v53 = vld [vmem:[#allocation2 + $0x168] sm:$0xff]  ;;  %v1061_v6 = vld [vmem:[#allocation2 + $0x90] sm:$0xff]  ;;  %v1067_v40 = vld [vmem:[#allocation2 + $0xc0] sm:$0xff] }
 0x139   : > { %4074 = vmatprep.mubr.bf16.mxu0 %v5199_v3  ;;  %v1068_v32 = vld [vmem:[#allocation2 + $0xc8] sm:$0xff]  ;;  %v5301_v51 = vld [vmem:[#allocation2 + $0x40] sm:$0xff]  ;;  %v4485_v43 = vld [vmem:[%s5845_s3 + $0x210] sm:$0xff]  }
 0x13a   : > { %v5213_v13 = vsel %vm4824_vm9, %v877_v24, %v942_v7  ;;  %v1041_v17 = vsel %vm4830_vm10, %v976_v27, %v1040_v10  ;;  %v867_v29 = vrot.slane %v865_v9, 7  ;;  %v973_v44 = vrot.slane %v868_v28, 1  ;;  %v1048_v36 = vld [vmem:[#allocation2 + $0x28] sm:$0xff]  ;;  %v5312_v50 = vld [vmem:[#allocation2 + $0x58] sm:$0xff]  ;;  %v5315_v52 = vld [vmem:[#allocation2 + $0x70] sm:$0xff] }
 0x13b   : > { %944 = vst [vmem:[#allocation2 + $0x180] sm:$0xff] %v5213_v13  ;;  %1042 = vst [vmem:[#allocation2 + $0x190] sm:$0xff] %v1041_v17  ;;  %v2200_v47 = vld [vmem:[#allocation2 + $0x128] sm:$0xff]  ;;  %v5328_v7 = vld [vmem:[#allocation2 + $0xa0] sm:$0xff] }
 0x13c   : > { %v870_v42 = vor.u32 %v868_v28, %v867_v29  ;;  %v974_v46 = vor.u32 %v973_v44, %v865_v9  ;;  %v4488_v16 = vld [vmem:[%s5845_s3 + $0x228] sm:$0xff]   ;;  %v4489_v27 = vld [vmem:[%s5845_s3 + $0x230] sm:$0xff]   ;;  %v5342_v44 = vld [vmem:[#allocation2 + $0xb8] sm:$0xff] }
 0x13d   : > { %v5324_v63 = vld [vmem:[#allocation2 + $0x88] sm:$0xff] }
 0x13e   : > { %1461 = vmatmul.mubr.bf16.gmra.mrb[40].mxu1 %v5067_v31  ;;  %v5221_v58 = vsel %vm4824_vm9, %v870_v42, %v939_v53  ;;  %v5225_v45 = vsel %vm4830_vm10, %v974_v46, %v1037_v33  ;;  %v5346_v53 = vld [vmem:[#allocation2 + $0xd0] sm:$0xff] }
 0x13f   : > { %1468 = vmatprep.mubr.bf16.mxu1 %v4980_v14  ;;  %941 = vst [vmem:[#allocation2 + $0x168] sm:$0xff] %v5221_v58  ;;  %1039 = vst [vmem:[#allocation2 + $0x178] sm:$0xff] %v5225_v45  ;;  %v4467_v14 = vld [vmem:[%s5845_s3 + $0x90] sm:$0xff]  }
 0x140   : > { %4075 = vmatmul.mubr.bf16.gmra.mrb[40].mxu0 %v1035_v61  ;;  %v2199_v61 = vld [vmem:[#allocation2 + $0x120] sm:$0xff] }
 0x141   : > { %4078 = vmatprep.mubr.bf16.mxu0 %v5225_v45 }
 0x146   : > { %1469 = vmatmul.mubr.bf16.gmra.mrb[44].mxu1 %v5057_v2  ;;  %v4470_v2 = vld [vmem:[%s5845_s3 + $0x98] sm:$0xff]  }
 0x147   : > { %1476 = vmatprep.mubr.bf16.mxu1 %v5023_v26 }
 0x148   : > { %4079 = vmatmul.mubr.bf16.gmra.mrb[44].mxu0 %v1041_v17 }
 0x149   : > { %1878 = vmatprep.mubr.bf16.mxu0 %v4508_v22 }
 0x14e   : > { %1477 = vmatmul.mubr.bf16.gmra.mrb[48].mxu1 %v5079_v38 }
 0x14f   : > { %1484 = vmatprep.mubr.bf16.mxu1 %v4805_v62 }
 0x150   : > { %1879 = vmatmul.mubr.bf16.vlgmr.msra.gmra.mrb[48].mxu0 %v4508_v22  ;;  %v1046_v22 = vld [vmem:[#allocation2 + $0x18] sm:$0xff] }
 0x151   : > { %4083 = vmatpush3.bf16.msra.mxu0 %v5126_v35  ;;  %1886 = vmatprep.mubr.bf16.mxu0 %v1047_v20  ;;  %v4479_v35 = vld [vmem:[%s5845_s3 + $0xa0] sm:$0xff]  }
 0x152   : > { %4084 = vmatprep.subr.bf16.mxu0 %v4464_v15 }
 0x155   : > { %4085 = vmatpush3.bf16.msra.mxu0 %v4464_v15 }
 0x156   : > { %1485 = vmatmul.mubr.bf16.gmra.mrb[52].mxu1 %v4984_v37  ;;  %4086 = vmatprep.subr.bf16.mxu0 %v4467_v14 }
 0x157   : > { %1492 = vmatprep.mubr.bf16.mxu1 %v5128_v39 }
 0x158   : > { %1887 = vmatmul.mubr.bf16.gmra.mrb[52].mxu0 %v1046_v22  ;;  %v4491_v22 = vld [vmem:[%s5847_s5] sm:$0xff]  }
 0x159   : > { %1894 = vmatprep.mubr.bf16.mxu0 %v1050_v48  ;;  %4087 = vmatpush3.bf16.msra.mxu0 %v4467_v14  ;;  %v5358_v14 = vld [vmem:[#allocation2 + $0x100] sm:$0xff] }
 0x15a   : > { %4088 = vmatprep.subr.bf16.mxu0 %v4470_v2  ;;  %4178 = vmatprep.subr.bf16.mxu1 %v4491_v22 }
 0x15d   : > { %4089 = vmatpush3.bf16.msra.mxu0 %v4470_v2 }
 0x15e   : > { %1493 = vmatmul.mubr.bf16.gmra.mrb[56].mxu1 %v5172_v8  ;;  %4090 = vmatprep.subr.bf16.mxu0 %v4479_v35 }
 0x15f   : > { %1500 = vmatprep.mubr.bf16.mxu1 %v5095_v41 }
 0x160   : > { %1895 = vmatmul.mubr.bf16.gmra.mrb[56].mxu0 %v1049_v56 }
 0x161   : > { %1902 = vmatprep.mubr.bf16.mxu0 %v1053_v57  ;;  %4091 = vmatpush3.bf16.msra.mxu0 %v4479_v35 }
 0x162   : > { %4092 = vmatprep.subr.bf16.mxu0 %v4480_v49 }
 0x165   : > { %4093 = vmatpush3.bf16.msra.mxu0 %v4480_v49 }
 0x166   : > { %1501 = vmatmul.mubr.bf16.gmra.mrb[60].mxu1 %v5154_v12  ;;  %4094 = vmatprep.subr.bf16.mxu0 %v4481_v4 }
 0x167   : > { %1508 = vmatprep.mubr.bf16.mxu1 %v5146_v19 }
 0x168   : > { %1903 = vmatmul.mubr.bf16.gmra.mrb[60].mxu0 %v1052_v1 }
 0x169   : > { %1910 = vmatprep.mubr.bf16.mxu0 %v1056_v60  ;;  %4095 = vmatpush3.bf16.msra.mxu0 %v4481_v4 }
 0x16a   : > { %4096 = vmatprep.subr.bf16.mxu0 %v4482_v11 }
 0x16d   : > { %4097 = vmatpush3.bf16.msra.mxu0 %v4482_v11 }
 0x16e   : > { %1509 = vmatmul.mubr.bf16.gmra.mrb[64].mxu1 %v5195_v59  ;;  %4130 = vmatprep.subr.bf16.mxu0 %v5268_v0 }
 0x16f   : > { %1516 = vmatprep.mubr.bf16.mxu1 %v5144_v34 }
 0x170   : > { %1911 = vmatmul.mubr.bf16.gmra.mrb[64].mxu0 %v1055_v55 }
 0x171   : > { %1918 = vmatprep.mubr.bf16.mxu0 %v1059_v5 }
 0x176   : > { %1517 = vmatmul.mubr.bf16.gmra.mrb[68].mxu1 %v5189_v54 }
 0x177   : > { %1524 = vmatprep.mubr.bf16.mxu1 %v5205_v18 }
 0x178   : > { %1919 = vmatmul.mubr.bf16.gmra.mrb[68].mxu0 %v1058_v23 }
 0x179   : > { %1926 = vmatprep.mubr.bf16.mxu0 %v1062_v30 }
 0x17e   : > { %1525 = vmatmul.mubr.bf16.gmra.mrb[72].mxu1 %v5221_v58 }
 0x17f   : > { %1532 = vmatprep.mubr.bf16.mxu1 %v5176_v25 }
 0x180   : > { %1927 = vmatmul.mubr.bf16.gmra.mrb[72].mxu0 %v1061_v6 }
 0x181   : > { %1934 = vmatprep.mubr.bf16.mxu0 %v4999_v21  ;;  %v2185_v21 = vld [vmem:[#allocation2 + $0xb0] sm:$0xff] }
 0x186   : > { %1533 = vmatmul.mubr.bf16.gmra.mrb[76].mxu1 %v5213_v13 }
 0x187   : > { %2442 = vmatprep.mubr.bf16.mxu1 %v1050_v48 }
 0x188   : > { %1935 = vmatmul.mubr.bf16.gmra.mrb[76].mxu0 %v5067_v31  ;;  %v2194_v31 = vld [vmem:[#allocation2 + $0xf8] sm:$0xff] }
 0x189   : > { %1942 = vmatprep.mubr.bf16.mxu0 %v1068_v32 }
 0x18e   : > { %2443 = vmatmul.mubr.bf16.vlgmr.msra.gmra.mrb[80].mxu1 %v1049_v56 }
 0x18f   : > { %2450 = vmatprep.mubr.bf16.mxu1 %v1053_v57  ;;  %4179 = vmatpush3.bf16.msra.mxu1 %v4491_v22  ;;  %v5373_v57 = vld [vmem:[#allocation2 + $0x130] sm:$0xff] }
 0x190   : > { %1943 = vmatmul.mubr.bf16.gmra.mrb[80].mxu0 %v1067_v40 }
 0x191   : > { %1950 = vmatprep.mubr.bf16.mxu0 %v5023_v26  ;;  %v2190_v26 = vld [vmem:[#allocation2 + $0xd8] sm:$0xff] }
 0x196   : > { %2451 = vmatmul.mubr.bf16.gmra.mrb[84].mxu1 %v1052_v1 }
 0x197   : > { %2458 = vmatprep.mubr.bf16.mxu1 %v1056_v60 }
 0x198   : > { %1951 = vmatmul.mubr.bf16.gmra.mrb[84].mxu0 %v5079_v38  ;;  %v5294_v38 = vld [vmem:[#allocation2 + $0x8] sm:$0xff] }
 0x199   : > { %1958 = vmatprep.mubr.bf16.mxu0 %v4805_v62  ;;  %v2184_v62 = vld [vmem:[#allocation2 + $0xa8] sm:$0xff] }
 0x19e   : > { %2459 = vmatmul.mubr.bf16.gmra.mrb[88].mxu1 %v1055_v55 }
 0x19f   : > { %2466 = vmatprep.mubr.bf16.mxu1 %v1059_v5  ;;  %v4492_v5 = vld [vmem:[%s5847_s5 + $0x8] sm:$0xff]  }
 0x1a0   : > { %1959 = vmatmul.mubr.bf16.gmra.mrb[88].mxu0 %v4984_v37  ;;  %v2191_v37 = vld [vmem:[#allocation2 + $0xe0] sm:$0xff]  ;;  %4180 = vmatprep.subr.bf16.mxu1 %v4492_v5 }
 0x1a1   : > { %1966 = vmatprep.mubr.bf16.mxu0 %v5128_v39  ;;  %4181 = vmatpush3.bf16.msra.mxu1 %v4492_v5 }
 0x1a6   : > { %2467 = vmatmul.mubr.bf16.gmra.mrb[92].mxu1 %v1058_v23 }
 0x1a7   : > { %2474 = vmatprep.mubr.bf16.mxu1 %v1062_v30 }
 0x1a8   : > { %1967 = vmatmul.mubr.bf16.gmra.mrb[92].mxu0 %v5172_v8 }
 0x1a9   : > { %1974 = vmatprep.mubr.bf16.mxu0 %v5095_v41  ;;  %v2193_v41 = vld [vmem:[#allocation2 + $0xf0] sm:$0xff] }
 0x1ae   : > { %2475 = vmatmul.mubr.bf16.gmra.mrb[96].mxu1 %v1061_v6 }
 0x1af   : > { %2482 = vmatprep.mubr.bf16.mxu1 %v2185_v21 }
 0x1b0   : > { %1975 = vmatmul.mubr.bf16.gmra.mrb[96].mxu0 %v5154_v12  ;;  %v4484_v12 = vld [vmem:[%s5845_s3 + $0x208] sm:$0xff]  }
 0x1b1   : > { %1982 = vmatprep.mubr.bf16.mxu0 %v5146_v19 }
 0x1b6   : > { %2483 = vmatmul.mubr.bf16.gmra.mrb[100].mxu1 %v2184_v62 }
 0x1b7   : > { %2490 = vmatprep.mubr.bf16.mxu1 %v1068_v32 }
 0x1b8   : > { %1983 = vmatmul.mubr.bf16.gmra.mrb[100].mxu0 %v5195_v59 }
 0x1b9   : > { %1990 = vmatprep.mubr.bf16.mxu0 %v5144_v34 }
 0x1be   : > { %2491 = vmatmul.mubr.bf16.gmra.mrb[104].mxu1 %v1067_v40 }
 0x1bf   : > { %2498 = vmatprep.mubr.bf16.mxu1 %v2191_v37 }
 0x1c0   : > { %1991 = vmatmul.mubr.bf16.gmra.mrb[104].mxu0 %v5189_v54 }
 0x1c1   : > { %1998 = vmatprep.mubr.bf16.mxu0 %v5205_v18 }
 0x1c6   : > { %2499 = vmatmul.mubr.bf16.gmra.mrb[108].mxu1 %v2190_v26 }
 0x1c7   : > { %2506 = vmatprep.mubr.bf16.mxu1 %v2194_v31 }
 0x1c8   : > { %1999 = vmatmul.mubr.bf16.gmra.mrb[108].mxu0 %v5221_v58 }
 0x1c9   : > { %4098 = vmatprep.mubr.bf16.mxu0 %v5294_v38 }
 0x1ce   : > { %2507 = vmatmul.mubr.bf16.gmra.mrb[112].mxu1 %v2193_v41  ;;  %v4493_v41 = vld [vmem:[%s5847_s5 + $0x10] sm:$0xff]  }
 0x1cf   : > { %2514 = vmatprep.mubr.bf16.mxu1 %v5128_v39  ;;  %v4486_v39 = vld [vmem:[%s5845_s3 + $0x218] sm:$0xff]   ;;  %4182 = vmatprep.subr.bf16.mxu1 %v4493_v41 }
 0x1d0   : > { %4099 = vmatmul.mubr.bf16.vlgmr.msra.gmra.mrb[16].mxu0 %v1048_v36  ;;  %4183 = vmatpush3.bf16.msra.mxu1 %v4493_v41 }
 0x1d1   : > { %4131 = vmatpush3.bf16.msra.mxu0 %v5268_v0  ;;  %4102 = vmatprep.mubr.bf16.mxu0 %v5301_v51 }
 0x1d2   : > { %4132 = vmatprep.subr.bf16.mxu0 %v4484_v12 }
 0x1d5   : > { %4133 = vmatpush3.bf16.msra.mxu0 %v4484_v12 }
 0x1d6   : > { %2515 = vmatmul.mubr.bf16.gmra.mrb[116].mxu1 %v5172_v8  ;;  %4134 = vmatprep.subr.bf16.mxu0 %v4485_v43  ;;  %v4487_v8 = vld [vmem:[%s5845_s3 + $0x220] sm:$0xff]  }
 0x1d7   : > { %2522 = vmatprep.mubr.bf16.mxu1 %v2200_v47 }
 0x1d8   : > { %4103 = vmatmul.mubr.bf16.gmra.mrb[20].mxu0 %v5312_v50 }
 0x1d9   : > { %4106 = vmatprep.mubr.bf16.mxu0 %v5315_v52  ;;  %4135 = vmatpush3.bf16.msra.mxu0 %v4485_v43 }
 0x1da   : > { %4136 = vmatprep.subr.bf16.mxu0 %v4486_v39 }
 0x1dd   : > { %4137 = vmatpush3.bf16.msra.mxu0 %v4486_v39 }
 0x1de   : > { %2523 = vmatmul.mubr.bf16.gmra.mrb[120].mxu1 %v2199_v61  ;;  %4138 = vmatprep.subr.bf16.mxu0 %v4487_v8 }
 0x1df   : > { %2530 = vmatprep.mubr.bf16.mxu1 %v5146_v19  ;;  %v3570_v10 = vpop.f32.mrb[16].mxu1  ;;  %v4490_v19 = vld [vmem:[%s5845_s3 + $0x238] sm:$0xff]  }
 0x1e0   : > { %4107 = vmatmul.mubr.bf16.gmra.mrb[24].mxu0 %v5324_v63  ;;  %v3571_v24 = vpop.f32.mrb[17].mxu1 }
 0x1e1   : > { %4110 = vmatprep.mubr.bf16.mxu0 %v5328_v7  ;;  %4139 = vmatpush3.bf16.msra.mxu0 %v4487_v8  ;;  %v5334_v9 = vadd.f32 %v3571_v24, %v3570_v10  ;;  %v3573_v28 = vpop.f32.mrb[18].mxu1  ;;  %v4494_v10 = vld [vmem:[%s5847_s5 + $0x18] sm:$0xff]  }
 0x1e2   : > { %4140 = vmatprep.subr.bf16.mxu0 %v4488_v16  ;;  %v3574_v17 = vpop.f32.mrb[19].mxu1  ;;  %4184 = vmatprep.subr.bf16.mxu1 %v4494_v10 }
 0x1e3   : > { %v5336_v29 = vadd.f32 %v3574_v17, %v3573_v28  ;;  %4185 = vmatpush3.bf16.msra.mxu1 %v4494_v10 }
 0x1e5   : > { %4141 = vmatpush3.bf16.msra.mxu0 %v4488_v16 }
 0x1e6   : > { %2531 = vmatmul.mubr.bf16.gmra.mrb[124].mxu1 %v5195_v59  ;;  %4142 = vmatprep.subr.bf16.mxu0 %v4489_v27 }
 0x1e7   : > { %2538 = vmatprep.mubr.bf16.mxu1 %v5144_v34  ;;  %v5354_v34 = vld [vmem:[#allocation2 + $0xe8] sm:$0xff] }
 0x1e8   : > { %4111 = vmatmul.mubr.bf16.gmra.mrb[28].mxu0 %v5342_v44  ;;  %v3576_v33 = vpop.f32.mrb[20].mxu1 }
 0x1e9   : > { %4114 = vmatprep.mubr.bf16.mxu0 %v5346_v53  ;;  %4143 = vmatpush3.bf16.msra.mxu0 %v4489_v27  ;;  %v3577_v42 = vpop.f32.mrb[21].mxu1 }
 0x1ea   : > { %4144 = vmatprep.subr.bf16.mxu0 %v4490_v19  ;;  %v5349_v59 = vadd.f32 %v3577_v42, %v3576_v33  ;;  %v3579_v46 = vpop.f32.mrb[22].mxu1 }
 0x1eb   : > { %v3580_v15 = vpop.f32.mrb[23].mxu1 }
 0x1ec   : > { %v5351_v20 = vadd.f32 %v3580_v15, %v3579_v46 }
 0x1ed   : > { %4145 = vmatpush3.bf16.msra.mxu0 %v4490_v19 }
 0x1ee   : > { %2539 = vmatmul.mubr.bf16.gmra.mrb[128].mxu1 %v5189_v54 }
 0x1ef   : > { %2546 = vmatprep.mubr.bf16.mxu1 %v5205_v18  ;;  %v5369_v18 = vld [vmem:[#allocation2 + $0x118] sm:$0xff] }
 0x1f0   : > { %4115 = vmatmul.mubr.bf16.gmra.mrb[32].mxu0 %v5354_v34  ;;  %v3582_v2 = vpop.f32.mrb[24].mxu1 }
 0x1f1   : > { %4118 = vmatprep.mubr.bf16.mxu0 %v5358_v14  ;;  %v3583_v48 = vpop.f32.mrb[25].mxu1 }
 0x1f2   : > { %v5364_v35 = vadd.f32 %v3583_v48, %v3582_v2  ;;  %v3585_v49 = vpop.f32.mrb[26].mxu1 }
 0x1f3   : > { %v3586_v54 = vpop.f32.mrb[27].mxu1 }
 0x1f4   : > { %v5366_v56 = vadd.f32 %v3586_v54, %v3585_v49 }
 0x1f6   : > { %2547 = vmatmul.mubr.bf16.gmra.mrb[132].mxu1 %v5221_v58 }
 0x1f7   : > { %2554 = vmatprep.mubr.bf16.mxu1 %v5176_v25  ;;  %v5383_v25 = vld [vmem:[#allocation2 + $0x160] sm:$0xff] }
 0x1f8   : > { %4119 = vmatmul.mubr.bf16.gmra.mrb[36].mxu0 %v5369_v18  ;;  %v3588_v4 = vpop.f32.mrb[28].mxu1 }
 0x1f9   : > { %4122 = vmatprep.mubr.bf16.mxu0 %v5373_v57  ;;  %v3589_v11 = vpop.f32.mrb[29].mxu1 }
 0x1fa   : > { %v5376_v1 = vadd.f32 %v3589_v11, %v3588_v4  ;;  %v3591_v60 = vpop.f32.mrb[30].mxu1 }
 0x1fb   : > { %v3592_v0 = vpop.f32.mrb[31].mxu1 }
 0x1fc   : > { %v5378_v55 = vadd.f32 %v3592_v0, %v3591_v60 }
 0x1fe   : > { %2555 = vmatmul.mubr.bf16.gmra.mrb[136].mxu1 %v5213_v13 }
 0x1ff   : > { %2562 = vmatprep.mubr.bf16.mxu1 %v5294_v38 }
 0x200   : > { %4123 = vmatmul.mubr.bf16.gmra.mrb[40].mxu0 %v5199_v3 }
 0x201   : > { %4126 = vmatprep.mubr.bf16.mxu0 %v5383_v25  ;;  %v3594_v58 = vpop.f32.mrb[32].mxu1 }
 0x202   : > { %v3595_v23 = vpop.f32.mrb[33].mxu1 }
 0x203   : > { %v5389_v30 = vadd.f32 %v3595_v23, %v3594_v58  ;;  %v3597_v6 = vpop.f32.mrb[34].mxu1 }
 0x204   : > { %v3598_v32 = vpop.f32.mrb[35].mxu1 }
 0x205   : > { %v5391_v13 = vadd.f32 %v3598_v32, %v3597_v6 }
 0x206   : > { %2563 = vmatmul.mubr.bf16.gmra.mrb[140].mxu1 %v5294_v38 }
 0x208   : > { %4127 = vmatmul.mubr.bf16.gmra.mrb[44].mxu0 %v5225_v45 }
 0x209   : > { %4146 = vmatprep.mubr.bf16.mxu0 %v5301_v51  ;;  %v3600_v3 = vpop.f32.mrb[36].mxu1 }
 0x20a   : > { %v3601_v40 = vpop.f32.mrb[37].mxu1 }
 0x20b   : > { %v5396_v21 = vadd.f32 %v3601_v40, %v3600_v3  ;;  %v3603_v62 = vpop.f32.mrb[38].mxu1 }
 0x20c   : > { %v3604_v37 = vpop.f32.mrb[39].mxu1 }
 0x20d   : > { %v5398_v26 = vadd.f32 %v3604_v37, %v3603_v62 }
 0x210   : > { %4147 = vmatmul.mubr.bf16.vlgmr.msra.gmra.mrb[16].mxu0 %v5312_v50 }
 0x211   : > { %4150 = vmatprep.mubr.bf16.mxu0 %v5315_v52  ;;  %v3606_v31 = vpop.f32.mrb[40].mxu1 }
 0x212   : > { %v3607_v45 = vpop.f32.mrb[41].mxu1 }
 0x213   : > { %v5405_v12 = vadd.f32 %v3607_v45, %v3606_v31  ;;  %v3609_v36 = vpop.f32.mrb[42].mxu1 }
 0x214   : > { %v3610_v51 = vpop.f32.mrb[43].mxu1 }
 0x215   : > { %v5407_v43 = vadd.f32 %v3610_v51, %v3609_v36  ;;  %v2204_v36 = vld [vmem:[#allocation2 + $0x148] sm:$0xff] }
 0x218   : > { %4151 = vmatmul.mubr.bf16.gmra.mrb[20].mxu0 %v5324_v63 }
 0x219   : > { %4154 = vmatprep.mubr.bf16.mxu0 %v5328_v7  ;;  %v3612_v47 = vpop.f32.mrb[44].mxu1 }
 0x21a   : > { %v3613_v39 = vpop.f32.mrb[45].mxu1 }
 0x21b   : > { %v5411_v50 = vadd.f32 %v3613_v39, %v3612_v47  ;;  %v3615_v52 = vpop.f32.mrb[46].mxu1 }
 0x21c   : > { %v3616_v8 = vpop.f32.mrb[47].mxu1 }
 0x21d   : > { %v5413_v61 = vadd.f32 %v3616_v8, %v3615_v52 }
 0x220   : > { %4155 = vmatmul.mubr.bf16.gmra.mrb[24].mxu0 %v5342_v44 }
 0x221   : > { %4158 = vmatprep.mubr.bf16.mxu0 %v5346_v53  ;;  %v3618_v16 = vpop.f32.mrb[48].mxu1 }
 0x222   : > { %v3619_v63 = vpop.f32.mrb[49].mxu1 }
 0x223   : > { %v5420_v24 = vadd.f32 %v3619_v63, %v3618_v16  ;;  %v3706_v7 = vpop.f32.mrb[48].mxu0  ;;  %v3621_v27 = vpop.f32.mrb[50].mxu1 }
 0x224   : > { %v3707_v28 = vpop.f32.mrb[49].mxu0  ;;  %v3622_v17 = vpop.f32.mrb[51].mxu1 }
 0x225   : > { %v3708_v19 = vadd.f32 %v3707_v28, %v3706_v7  ;;  %v5422_v33 = vadd.f32 %v3622_v17, %v3621_v27  ;;  %v3709_v44 = vpop.f32.mrb[50].mxu0  ;;  %v4496_v27 = vld [vmem:[%s5847_s5 + $0x28] sm:$0xff]   ;;  %v2210_v17 = vld [vmem:[#allocation2 + $0x178] sm:$0xff] }
 0x226   : > { %v3710_v42 = vpop.f32.mrb[51].mxu0 }
 0x227   : > { %v5425_v53 = vadd.f32 %v3708_v19, %v5334_v9  ;;  %v3711_v46 = vadd.f32 %v3710_v42, %v3709_v44  ;;  %v2213_v19 = vld [vmem:[#allocation2 + $0x190] sm:$0xff] }
 0x228   : > { %4159 = vmatmul.mubr.bf16.gmra.mrb[28].mxu0 %v5354_v34  ;;  %v4495_v34 = vld [vmem:[%s5847_s5 + $0x20] sm:$0xff]  }
 0x229   : > { %v5429_v15 = vadd.f32 %v3711_v46, %v5336_v29  ;;  %4162 = vmatprep.mubr.bf16.mxu0 %v5358_v14  ;;  %v3624_v2 = vpop.f32.mrb[52].mxu1  ;;  %4186 = vmatprep.subr.bf16.mxu1 %v4495_v34 }
 0x22a   : > { %v3625_v22 = vpop.f32.mrb[53].mxu1  ;;  %4187 = vmatpush3.bf16.msra.mxu1 %v4495_v34 }
 0x22b   : > { %v5432_v48 = vadd.f32 %v3625_v22, %v3624_v2  ;;  %v3712_v49 = vpop.f32.mrb[52].mxu0  ;;  %v3627_v54 = vpop.f32.mrb[54].mxu1  ;;  %4188 = vmatprep.subr.bf16.mxu1 %v4496_v27 }
 0x22c   : > { %v3713_v4 = vpop.f32.mrb[53].mxu0  ;;  %v3628_v11 = vpop.f32.mrb[55].mxu1 }
 0x22d   : > { %v3714_v60 = vadd.f32 %v3713_v4, %v3712_v49  ;;  %v5434_v0 = vadd.f32 %v3628_v11, %v3627_v54  ;;  %v3715_v9 = vpop.f32.mrb[54].mxu0 }
 0x22e   : > { %v3716_v29 = vpop.f32.mrb[55].mxu0  ;;  %4189 = vmatpush3.bf16.msra.mxu1 %v4496_v27 }
 0x22f   : > { %v5440_v58 = vadd.f32 %v3714_v60, %v5349_v59  ;;  %v3717_v14 = vadd.f32 %v3716_v29, %v3715_v9 }
 0x230   : > { %4163 = vmatmul.mubr.bf16.gmra.mrb[32].mxu0 %v5369_v18 }
 0x231   : > { %v5444_v5 = vadd.f32 %v3717_v14, %v5351_v20  ;;  %4166 = vmatprep.mubr.bf16.mxu0 %v5373_v57  ;;  %v3630_v23 = vpop.f32.mrb[56].mxu1 }
 0x232   : > { %v3631_v6 = vpop.f32.mrb[57].mxu1 }
 0x233   : > { %v5447_v32 = vadd.f32 %v3631_v6, %v3630_v23  ;;  %v3718_v3 = vpop.f32.mrb[56].mxu0  ;;  %v3633_v40 = vpop.f32.mrb[58].mxu1 }
 0x234   : > { %v3719_v62 = vpop.f32.mrb[57].mxu0  ;;  %v3634_v37 = vpop.f32.mrb[59].mxu1 }
 0x235   : > { %v3720_v59 = vadd.f32 %v3719_v62, %v3718_v3  ;;  %v5449_v31 = vadd.f32 %v3634_v37, %v3633_v40  ;;  %v3721_v41 = vpop.f32.mrb[58].mxu0 }
 0x236   : > { %v3722_v45 = vpop.f32.mrb[59].mxu0 }
 0x237   : > { %v5452_v18 = vadd.f32 %v3720_v59, %v5364_v35  ;;  %v3723_v20 = vadd.f32 %v3722_v45, %v3721_v41 }
 0x238   : > { %4167 = vmatmul.mubr.bf16.gmra.mrb[36].mxu0 %v2204_v36 }
 0x239   : > { %v5455_v57 = vadd.f32 %v3723_v20, %v5366_v56  ;;  %4170 = vmatprep.mubr.bf16.mxu0 %v5383_v25  ;;  %v3636_v51 = vpop.f32.mrb[60].mxu1 }
 0x23a   : > { %v3637_v47 = vpop.f32.mrb[61].mxu1 }
 0x23b   : > { %v5458_v39 = vadd.f32 %v3637_v47, %v3636_v51  ;;  %v3724_v52 = vpop.f32.mrb[60].mxu0  ;;  %v3639_v8 = vpop.f32.mrb[62].mxu1 }
 0x23c   : > { %v3725_v16 = vpop.f32.mrb[61].mxu0  ;;  %v3640_v10 = vpop.f32.mrb[63].mxu1 }
 0x23d   : > { %v3726_v63 = vadd.f32 %v3725_v16, %v3724_v52  ;;  %v5460_v7 = vadd.f32 %v3640_v10, %v3639_v8  ;;  %v3727_v35 = vpop.f32.mrb[62].mxu0 }
 0x23e   : > { %v3728_v56 = vpop.f32.mrb[63].mxu0 }
 0x23f   : > { %v5466_v28 = vadd.f32 %v3726_v63, %v5376_v1  ;;  %v3729_v25 = vadd.f32 %v3728_v56, %v3727_v35 }
 0x240   : > { %4171 = vmatmul.mubr.bf16.gmra.mrb[40].mxu0 %v2210_v17 }
 0x241   : > { %v5469_v44 = vadd.f32 %v3729_v25, %v5378_v55  ;;  %4174 = vmatprep.mubr.bf16.mxu0 %v2213_v19  ;;  %v3642_v42 = vpop.f32.mrb[64].mxu1 }
 0x242   : > { %v3643_v46 = vpop.f32.mrb[65].mxu1 }
 0x243   : > { %v5471_v2 = vadd.f32 %v3643_v46, %v3642_v42  ;;  %v3730_v22 = vpop.f32.mrb[64].mxu0  ;;  %v3645_v49 = vpop.f32.mrb[66].mxu1 }
 0x244   : > { %v3731_v54 = vpop.f32.mrb[65].mxu0  ;;  %v3646_v4 = vpop.f32.mrb[67].mxu1 }
 0x245   : > { %v3732_v1 = vadd.f32 %v3731_v54, %v3730_v22  ;;  %v5473_v11 = vadd.f32 %v3646_v4, %v3645_v49  ;;  %v3733_v60 = vpop.f32.mrb[66].mxu0 }
 0x246   : > { %v3734_v9 = vpop.f32.mrb[67].mxu0 }
 0x247   : > { %v5476_v34 = vadd.f32 %v3732_v1, %v5389_v30  ;;  %v3735_v29 = vadd.f32 %v3734_v9, %v3733_v60  ;;  %v4497_v30 = vld [vmem:[%s5847_s5 + $0x30] sm:$0xff]  }
 0x248   : > { %4175 = vmatmul.mubr.bf16.gmra.mrb[44].mxu0 %v5294_v38  ;;  %4190 = vmatprep.subr.bf16.mxu1 %v4497_v30 }
 0x249   : > { %v5480_v55 = vadd.f32 %v3735_v29, %v5391_v13  ;;  %v3648_v14 = vpop.f32.mrb[68].mxu1  ;;  %4191 = vmatpush3.bf16.msra.mxu1 %v4497_v30 }
 0x24a   : > { %v3649_v23 = vpop.f32.mrb[69].mxu1 }
 0x24b   : > { %v5482_v6 = vadd.f32 %v3649_v23, %v3648_v14  ;;  %v3736_v3 = vpop.f32.mrb[68].mxu0  ;;  %v3651_v40 = vpop.f32.mrb[70].mxu1 }
 0x24c   : > { %v3737_v62 = vpop.f32.mrb[69].mxu0  ;;  %v3652_v37 = vpop.f32.mrb[71].mxu1 }
 0x24d   : > { %v3738_v59 = vadd.f32 %v3737_v62, %v3736_v3  ;;  %v5484_v41 = vadd.f32 %v3652_v37, %v3651_v40  ;;  %v3739_v45 = vpop.f32.mrb[70].mxu0 }
 0x24e   : > { %v3740_v38 = vpop.f32.mrb[71].mxu0 }
 0x24f   : > { %v5490_v13 = vadd.f32 %v3738_v59, %v5396_v21  ;;  %v3741_v20 = vadd.f32 %v3740_v38, %v3739_v45 }
 0x251   : > { %v5493_v36 = vadd.f32 %v3741_v20, %v5398_v26  ;;  %v3654_v51 = vpop.f32.mrb[72].mxu1 }
 0x252   : > { %v3655_v47 = vpop.f32.mrb[73].mxu1 }
 0x253   : > { %v5495_v52 = vadd.f32 %v3655_v47, %v3654_v51  ;;  %v3742_v8 = vpop.f32.mrb[72].mxu0  ;;  %v3657_v16 = vpop.f32.mrb[74].mxu1 }
 0x254   : > { %v3743_v10 = vpop.f32.mrb[73].mxu0  ;;  %v3658_v63 = vpop.f32.mrb[75].mxu1 }
 0x255   : > { %v3744_v35 = vadd.f32 %v3743_v10, %v3742_v8  ;;  %v5497_v27 = vadd.f32 %v3658_v63, %v3657_v16  ;;  %v3745_v56 = vpop.f32.mrb[74].mxu0 }
 0x256   : > { %v3746_v21 = vpop.f32.mrb[75].mxu0 }
 0x257   : > { %v5500_v25 = vadd.f32 %v3744_v35, %v5405_v12  ;;  %v3747_v17 = vadd.f32 %v3746_v21, %v3745_v56  ;;  %v4498_v12 = vld [vmem:[%s5847_s5 + $0x38] sm:$0xff]  }
 0x258   : > { %4192 = vmatprep.subr.bf16.mxu1 %v4498_v12 }
 0x259   : > { %v5503_v26 = vadd.f32 %v3747_v17, %v5407_v43  ;;  %v3660_v19 = vpop.f32.mrb[76].mxu1  ;;  %4193 = vmatpush3.bf16.msra.mxu1 %v4498_v12 }
 0x25a   : > { %v3661_v42 = vpop.f32.mrb[77].mxu1 }
 0x25b   : > { %v5505_v46 = vadd.f32 %v3661_v42, %v3660_v19  ;;  %v3748_v22 = vpop.f32.mrb[76].mxu0  ;;  %v3663_v49 = vpop.f32.mrb[78].mxu1 }
 0x25c   : > { %v3749_v54 = vpop.f32.mrb[77].mxu0  ;;  %v3664_v4 = vpop.f32.mrb[79].mxu1 }
 0x25d   : > { %v3750_v1 = vadd.f32 %v3749_v54, %v3748_v22  ;;  %v5507_v60 = vadd.f32 %v3664_v4, %v3663_v49  ;;  %v3751_v9 = vpop.f32.mrb[78].mxu0 }
 0x25e   : > { %v3752_v29 = vpop.f32.mrb[79].mxu0 }
 0x25f   : > { %v5513_v43 = vadd.f32 %v3750_v1, %v5411_v50  ;;  %v3753_v14 = vadd.f32 %v3752_v29, %v3751_v9 }
 0x261   : > { %v5516_v23 = vadd.f32 %v3753_v14, %v5413_v61  ;;  %v3842_v3 = vpop.f32.mrb[80].mxu1 }
 0x262   : > { %v3843_v40 = vpop.f32.mrb[81].mxu1 }
 0x263   : > { %v3754_v62 = vpop.f32.mrb[80].mxu0  ;;  %v3844_v37 = vadd.f32 %v3843_v40, %v3842_v3  ;;  %v3845_v59 = vpop.f32.mrb[82].mxu1 }
 0x264   : > { %v3755_v45 = vpop.f32.mrb[81].mxu0  ;;  %v3846_v30 = vpop.f32.mrb[83].mxu1 }
 0x265   : > { %v3756_v38 = vadd.f32 %v3755_v45, %v3754_v62  ;;  %v3757_v20 = vpop.f32.mrb[82].mxu0  ;;  %v3847_v51 = vadd.f32 %v3846_v30, %v3845_v59  ;;  %v5519_v47 = vadd.f32 %v5425_v53, %v3844_v37 }
 0x266   : > { %v3758_v50 = vpop.f32.mrb[83].mxu0 }
 0x267   : > { %v5522_v8 = vadd.f32 %v3756_v38, %v5420_v24  ;;  %v3759_v16 = vadd.f32 %v3758_v50, %v3757_v20  ;;  %v5525_v61 = vadd.f32 %v5429_v15, %v3847_v51 }
 0x269   : > { %v5528_v10 = vadd.f32 %v3759_v16, %v5422_v33  ;;  %v3848_v63 = vpop.f32.mrb[84].mxu1 }
 0x26a   : > { %v3849_v35 = vpop.f32.mrb[85].mxu1 }
 0x26b   : > { %v3760_v56 = vpop.f32.mrb[84].mxu0  ;;  %v3850_v21 = vadd.f32 %v3849_v35, %v3848_v63  ;;  %v3851_v17 = vpop.f32.mrb[86].mxu1 }
 0x26c   : > { %v3761_v19 = vpop.f32.mrb[85].mxu0  ;;  %v3852_v42 = vpop.f32.mrb[87].mxu1 }
 0x26d   : > { %v3762_v53 = vadd.f32 %v3761_v19, %v3760_v56  ;;  %v3763_v22 = vpop.f32.mrb[86].mxu0  ;;  %v3853_v49 = vadd.f32 %v3852_v42, %v3851_v17  ;;  %v5531_v24 = vadd.f32 %v5440_v58, %v3850_v21 }
 0x26e   : > { %v3764_v54 = vpop.f32.mrb[87].mxu0 }
 0x26f   : > { %v5534_v15 = vadd.f32 %v3762_v53, %v5432_v48  ;;  %v3765_v4 = vadd.f32 %v3764_v54, %v3763_v22  ;;  %v5537_v33 = vadd.f32 %v5444_v5, %v3853_v49 }
 0x271   : > { %v5540_v1 = vadd.f32 %v3765_v4, %v5434_v0  ;;  %v3854_v9 = vpop.f32.mrb[88].mxu1 }
 0x272   : > { %v3855_v12 = vpop.f32.mrb[89].mxu1 }
 0x273   : > { %v3766_v29 = vpop.f32.mrb[88].mxu0  ;;  %v3856_v14 = vadd.f32 %v3855_v12, %v3854_v9  ;;  %v3857_v3 = vpop.f32.mrb[90].mxu1 }
 0x274   : > { %v3767_v40 = vpop.f32.mrb[89].mxu0  ;;  %v3858_v62 = vpop.f32.mrb[91].mxu1 }
 0x275   : > { %v3768_v58 = vadd.f32 %v3767_v40, %v3766_v29  ;;  %v3769_v37 = vpop.f32.mrb[90].mxu0  ;;  %v3859_v59 = vadd.f32 %v3858_v62, %v3857_v3  ;;  %v5543_v48 = vadd.f32 %v5452_v18, %v3856_v14 }
 0x276   : > { %v3770_v45 = vpop.f32.mrb[91].mxu0 }
 0x277   : > { %v5546_v5 = vadd.f32 %v3768_v58, %v5447_v32  ;;  %v3771_v30 = vadd.f32 %v3770_v45, %v3769_v37  ;;  %v5549_v0 = vadd.f32 %v5455_v57, %v3859_v59 }
 0x279   : > { %v5552_v38 = vadd.f32 %v3771_v30, %v5449_v31  ;;  %v3860_v20 = vpop.f32.mrb[92].mxu1 }
 0x27a   : > { %v3861_v51 = vpop.f32.mrb[93].mxu1 }
 0x27b   : > { %v3772_v50 = vpop.f32.mrb[92].mxu0  ;;  %v3862_v16 = vadd.f32 %v3861_v51, %v3860_v20  ;;  %v3863_v63 = vpop.f32.mrb[94].mxu1 }
 0x27c   : > { %v3773_v35 = vpop.f32.mrb[93].mxu0  ;;  %v3864_v56 = vpop.f32.mrb[95].mxu1 }
 0x27d   : > { %v3774_v18 = vadd.f32 %v3773_v35, %v3772_v50  ;;  %v3775_v21 = vpop.f32.mrb[94].mxu0  ;;  %v3865_v17 = vadd.f32 %v3864_v56, %v3863_v63  ;;  %v5555_v32 = vadd.f32 %v5466_v28, %v3862_v16 }
 0x27e   : > { %v3776_v19 = vpop.f32.mrb[95].mxu0 }
 0x27f   : > { %v5558_v57 = vadd.f32 %v3774_v18, %v5458_v39  ;;  %v3777_v42 = vadd.f32 %v3776_v19, %v3775_v21  ;;  %v5561_v31 = vadd.f32 %v5469_v44, %v3865_v17 }
 0x281   : > { %v5564_v53 = vadd.f32 %v3777_v42, %v5460_v7  ;;  %v3866_v22 = vpop.f32.mrb[96].mxu1 }
 0x282   : > { %v3867_v49 = vpop.f32.mrb[97].mxu1 }
 0x283   : > { %v3778_v54 = vpop.f32.mrb[96].mxu0  ;;  %v3868_v4 = vadd.f32 %v3867_v49, %v3866_v22  ;;  %v3869_v9 = vpop.f32.mrb[98].mxu1 }
 0x284   : > { %v3779_v12 = vpop.f32.mrb[97].mxu0  ;;  %v3870_v29 = vpop.f32.mrb[99].mxu1 }
 0x285   : > { %v3780_v28 = vadd.f32 %v3779_v12, %v3778_v54  ;;  %v3781_v14 = vpop.f32.mrb[98].mxu0  ;;  %v3871_v3 = vadd.f32 %v3870_v29, %v3869_v9  ;;  %v5567_v39 = vadd.f32 %v5476_v34, %v3868_v4 }
 0x286   : > { %v3782_v40 = vpop.f32.mrb[99].mxu0 }
 0x287   : > { %v5570_v44 = vadd.f32 %v3780_v28, %v5471_v2  ;;  %v3783_v62 = vadd.f32 %v3782_v40, %v3781_v14  ;;  %v5573_v7 = vadd.f32 %v5480_v55, %v3871_v3 }
 0x289   : > { %v5576_v58 = vadd.f32 %v3783_v62, %v5473_v11  ;;  %v3872_v37 = vpop.f32.mrb[100].mxu1 }
 0x28a   : > { %v3873_v59 = vpop.f32.mrb[101].mxu1 }
 0x28b   : > { %v3784_v45 = vpop.f32.mrb[100].mxu0  ;;  %v3874_v30 = vadd.f32 %v3873_v59, %v3872_v37  ;;  %v3875_v20 = vpop.f32.mrb[102].mxu1 }
 0x28c   : > { %v3785_v51 = vpop.f32.mrb[101].mxu0  ;;  %v3876_v50 = vpop.f32.mrb[103].mxu1 }
 0x28d   : > { %v3786_v34 = vadd.f32 %v3785_v51, %v3784_v45  ;;  %v3787_v16 = vpop.f32.mrb[102].mxu0  ;;  %v3877_v63 = vadd.f32 %v3876_v50, %v3875_v20  ;;  %v5579_v2 = vadd.f32 %v5490_v13, %v3874_v30 }
 0x28e   : > { %v3788_v35 = vpop.f32.mrb[103].mxu0 }
 0x28f   : > { %v5582_v55 = vadd.f32 %v3786_v34, %v5482_v6  ;;  %v3789_v56 = vadd.f32 %v3788_v35, %v3787_v16  ;;  %v5585_v11 = vadd.f32 %v5493_v36, %v3877_v63 }
 0x291   : > { %v5588_v18 = vadd.f32 %v3789_v56, %v5484_v41  ;;  %v3878_v21 = vpop.f32.mrb[104].mxu1 }
 0x292   : > { %v3879_v17 = vpop.f32.mrb[105].mxu1 }
 0x293   : > { %v3790_v19 = vpop.f32.mrb[104].mxu0  ;;  %v3880_v42 = vadd.f32 %v3879_v17, %v3878_v21  ;;  %v3881_v22 = vpop.f32.mrb[106].mxu1 }
 0x294   : > { %v3791_v49 = vpop.f32.mrb[105].mxu0  ;;  %v3882_v54 = vpop.f32.mrb[107].mxu1 }
 0x295   : > { %v3792_v13 = vadd.f32 %v3791_v49, %v3790_v19  ;;  %v3793_v4 = vpop.f32.mrb[106].mxu0  ;;  %v3883_v9 = vadd.f32 %v3882_v54, %v3881_v22  ;;  %v5591_v6 = vadd.f32 %v5500_v25, %v3880_v42 }
 0x296   : > { %v3794_v12 = vpop.f32.mrb[107].mxu0 }
 0x297   : > { %v5594_v36 = vadd.f32 %v3792_v13, %v5495_v52  ;;  %v3795_v29 = vadd.f32 %v3794_v12, %v3793_v4  ;;  %v5597_v41 = vadd.f32 %v5503_v26, %v3883_v9 }
 0x299   : > { %v5600_v28 = vadd.f32 %v3795_v29, %v5497_v27  ;;  %v3884_v14 = vpop.f32.mrb[108].mxu1 }
 0x29a   : > { %v3885_v3 = vpop.f32.mrb[109].mxu1 }
 0x29b   : > { %v3796_v40 = vpop.f32.mrb[108].mxu0  ;;  %v3886_v62 = vadd.f32 %v3885_v3, %v3884_v14  ;;  %v3887_v37 = vpop.f32.mrb[110].mxu1 }
 0x29c   : > { %v3797_v59 = vpop.f32.mrb[109].mxu0  ;;  %v3888_v45 = vpop.f32.mrb[111].mxu1 }
 0x29d   : > { %v3798_v25 = vadd.f32 %v3797_v59, %v3796_v40  ;;  %v3799_v30 = vpop.f32.mrb[110].mxu0  ;;  %v3889_v20 = vadd.f32 %v3888_v45, %v3887_v37  ;;  %v5603_v52 = vadd.f32 %v5513_v43, %v3886_v62 }
 0x29e   : > { %v3800_v51 = vpop.f32.mrb[111].mxu0 }
 0x29f   : > { %v5606_v26 = vadd.f32 %v3798_v25, %v5505_v46  ;;  %v3801_v50 = vadd.f32 %v3800_v51, %v3799_v30  ;;  %v5609_v27 = vadd.f32 %v5516_v23, %v3889_v20 }
 0x2a1   : > { %v5612_v34 = vadd.f32 %v3801_v50, %v5507_v60  ;;  %v3890_v16 = vpop.f32.mrb[112].mxu1 }
 0x2a2   : > { %v3891_v63 = vpop.f32.mrb[113].mxu1 }
 0x2a3   : > { %v3892_v35 = vadd.f32 %v3891_v63, %v3890_v16  ;;  %v3893_v56 = vpop.f32.mrb[114].mxu1 }
 0x2a4   : > { %v3894_v21 = vpop.f32.mrb[115].mxu1 }
 0x2a5   : > { %v3895_v17 = vadd.f32 %v3894_v21, %v3893_v56  ;;  %v5615_v43 = vadd.f32 %v5522_v8, %v3892_v35 }
 0x2a7   : > { %v5618_v19 = vadd.f32 %v5528_v10, %v3895_v17 }
 0x2a9   : > { %v3896_v46 = vpop.f32.mrb[116].mxu1 }
 0x2aa   : > { %v3897_v42 = vpop.f32.mrb[117].mxu1 }
 0x2ab   : > { %v3898_v22 = vadd.f32 %v3897_v42, %v3896_v46  ;;  %v3899_v23 = vpop.f32.mrb[118].mxu1 }
 0x2ac   : > { %v3900_v49 = vpop.f32.mrb[119].mxu1 }
 0x2ad   : > { %v3901_v54 = vadd.f32 %v3900_v49, %v3899_v23  ;;  %v5621_v60 = vadd.f32 %v5534_v15, %v3898_v22 }
 0x2af   : > { %v5624_v13 = vadd.f32 %v5540_v1, %v3901_v54 }
 0x2b1   : > { %v3902_v4 = vpop.f32.mrb[120].mxu1 }
 0x2b2   : > { %v3903_v9 = vpop.f32.mrb[121].mxu1 }
 0x2b3   : > { %v3904_v12 = vadd.f32 %v3903_v9, %v3902_v4  ;;  %v3905_v8 = vpop.f32.mrb[122].mxu1 }
 0x2b4   : > { %v3906_v29 = vpop.f32.mrb[123].mxu1 }
 0x2b5   : > { %v3907_v14 = vadd.f32 %v3906_v29, %v3905_v8  ;;  %v5627_v10 = vadd.f32 %v5546_v5, %v3904_v12 }
 0x2b7   : > { %v5630_v3 = vadd.f32 %v5552_v38, %v3907_v14 }
 0x2b9   : > { %v3908_v40 = vpop.f32.mrb[124].mxu1 }
 0x2ba   : > { %v3909_v62 = vpop.f32.mrb[125].mxu1 }
 0x2bb   : > { %v3910_v37 = vadd.f32 %v3909_v62, %v3908_v40  ;;  %v3911_v15 = vpop.f32.mrb[126].mxu1 }
 0x2bc   : > { %v3912_v59 = vpop.f32.mrb[127].mxu1 }
 0x2bd   : > { %v3913_v45 = vadd.f32 %v3912_v59, %v3911_v15  ;;  %v5633_v1 = vadd.f32 %v5558_v57, %v3910_v37 }
 0x2bf   : > { %v5636_v25 = vadd.f32 %v5564_v53, %v3913_v45 }
 0x2c1   : > { %v3914_v30 = vpop.f32.mrb[128].mxu1 }
 0x2c2   : > { %v3915_v20 = vpop.f32.mrb[129].mxu1 }
 0x2c3   : > { %v3916_v51 = vadd.f32 %v3915_v20, %v3914_v30  ;;  %v3917_v5 = vpop.f32.mrb[130].mxu1 }
 0x2c4   : > { %v3918_v50 = vpop.f32.mrb[131].mxu1 }
 0x2c5   : > { %v3919_v16 = vadd.f32 %v3918_v50, %v3917_v5  ;;  %v5639_v38 = vadd.f32 %v5570_v44, %v3916_v51 }
 0x2c7   : > { %v5642_v63 = vadd.f32 %v5576_v58, %v3919_v16 }
 0x2c9   : > { %v3920_v35 = vpop.f32.mrb[132].mxu1 }
 0x2ca   : > { %v3921_v56 = vpop.f32.mrb[133].mxu1 }
 0x2cb   : > { %v3922_v21 = vadd.f32 %v3921_v56, %v3920_v35  ;;  %v3923_v57 = vpop.f32.mrb[134].mxu1 }
 0x2cc   : > { %v3924_v17 = vpop.f32.mrb[135].mxu1 }
 0x2cd   : > { %v3925_v46 = vadd.f32 %v3924_v17, %v3923_v57  ;;  %v5645_v53 = vadd.f32 %v5582_v55, %v3922_v21 }
 0x2cf   : > { %v5648_v42 = vadd.f32 %v5588_v18, %v3925_v46 }
 0x2d1   : > { %v3926_v22 = vpop.f32.mrb[136].mxu1 }
 0x2d2   : > { %v3927_v23 = vpop.f32.mrb[137].mxu1 }
 0x2d3   : > { %v3928_v49 = vadd.f32 %v3927_v23, %v3926_v22  ;;  %v3929_v44 = vpop.f32.mrb[138].mxu1 }
 0x2d4   : > { %v3930_v54 = vpop.f32.mrb[139].mxu1 }
 0x2d5   : > { %v3931_v4 = vadd.f32 %v3930_v54, %v3929_v44  ;;  %v5651_v58 = vadd.f32 %v5594_v36, %v3928_v49  ;;  %v5665_v36 = vld [vmem:[%s5846_s4] ss:$0 sm:$0xff] }
 0x2d7   : > { %v5654_v9 = vadd.f32 %v5600_v28, %v3931_v4 }
 0x2d9   : > { %v3932_v12 = vpop.f32.mrb[140].mxu1 }
 0x2da   : > { %v3933_v8 = vpop.f32.mrb[141].mxu1 }
 0x2db   : > { %v3934_v29 = vadd.f32 %v3933_v8, %v3932_v12  ;;  %v3935_v55 = vpop.f32.mrb[142].mxu1 }
 0x2dc   : > { %v3936_v14 = vpop.f32.mrb[143].mxu1 }
 0x2dd   : > { %v3937_v40 = vadd.f32 %v3936_v14, %v3935_v55  ;;  %v5657_v18 = vadd.f32 %v5606_v26, %v3934_v29 }
 0x2df   : > { %v5660_v62 = vadd.f32 %v5612_v34, %v3937_v40 }
 0x2e3   : > { %v4148_v37 = vpop.f32.mrb[16].mxu0 }
 0x2e4   : > { %v4244_v28 = vadd.f32 %v5531_v24, %v4148_v37  ;;  %v2605_v15 = vpop.f32.mrb[17].mxu0 }
 0x2e5   : > { %v4247_v59 = vadd.f32 %v5519_v47, %v2605_v15  ;;  %v4149_v45 = vpop.f32.mrb[18].mxu0 }
 0x2e6   : > { %v2773_v30 = vadd.f32 %v4244_v28, %v5665_v36  ;;  %v4250_v26 = vadd.f32 %v5537_v33, %v4149_v45  ;;  %v2608_v20 = vpop.f32.mrb[19].mxu0 }
 0x2e7   : > { %v2771_v34 = vadd.f32 %v4247_v59, %v5665_v36  ;;  %v4253_v51 = vadd.f32 %v5525_v61, %v2608_v20 }
 0x2e8   : > { %v2805_v5 = vmul.f32 0.01, %v2773_v30  ;;  %v2774_v50 = vadd.f32 %v4250_v26, %v5665_v36 }
 0x2e9   : > { %v2803_v16 = vmul.f32 0.01, %v2771_v34  ;;  %v2772_v35 = vadd.f32 %v4253_v51, %v5665_v36 }
 0x2ea   : > { %v2806_v24 = vmul.f32 0.01, %v2774_v50  ;;  %v2837_v47 = vmax.f32 %v2773_v30, %v2805_v5 }
 0x2eb   : > { %v2804_v56 = vmul.f32 0.01, %v2772_v35  ;;  %v4152_v21 = vpop.f32.mrb[20].mxu0  ;;  %v2835_v33 = vmax.f32 %v2771_v34, %v2803_v16 }
 0x2ec   : > { %v2838_v57 = vmax.f32 %v2774_v50, %v2806_v24  ;;  %v4256_v17 = vadd.f32 %v5555_v32, %v4152_v21  ;;  %v2621_v46 = vpop.f32.mrb[21].mxu0 }
 0x2ed   : > { %v2836_v22 = vmax.f32 %v2772_v35, %v2804_v56  ;;  %v4259_v23 = vadd.f32 %v5543_v48, %v2621_v46  ;;  %v4153_v49 = vpop.f32.mrb[22].mxu0 }
 0x2ee   : > { %v2868_v61 = vpack.c.bf16 %v2838_v57, %v2837_v47  ;;  %v2777_v44 = vadd.f32 %v4256_v17, %v5665_v36  ;;  %v4262_v54 = vadd.f32 %v5561_v31, %v4153_v49  ;;  %v2624_v4 = vpop.f32.mrb[23].mxu0 }
 0x2ef   : > { %v2775_v12 = vadd.f32 %v4259_v23, %v5665_v36  ;;  %v4265_v8 = vadd.f32 %v5549_v0, %v2624_v4  ;;  %v2867_v29 = vpack.c.bf16 %v2836_v22, %v2835_v33 }
 0x2f0   : > { %v2809_v55 = vmul.f32 0.01, %v2777_v44  ;;  %v2778_v32 = vadd.f32 %v4262_v54, %v5665_v36 }
 0x2f1   : > { %v2807_v14 = vmul.f32 0.01, %v2775_v12  ;;  %v2776_v40 = vadd.f32 %v4265_v8, %v5665_v36  ;;  %4194 = vmatprep.mubr.bf16.mxu1 %v2867_v29 }
 0x2f2   : > { %v2810_v48 = vmul.f32 0.01, %v2778_v32  ;;  %4195 = vmatmul.mubr.bf16.vlgmr.msra.gmra.mrb[144].mxu1 %v2868_v61  ;;  %v2841_v15 = vmax.f32 %v2777_v44, %v2809_v55 }
 0x2f3   : > { %v2808_v37 = vmul.f32 0.01, %v2776_v40  ;;  %v4156_v28 = vpop.f32.mrb[24].mxu0  ;;  %v2839_v30 = vmax.f32 %v2775_v12, %v2807_v14 }
 0x2f4   : > { %v2842_v59 = vmax.f32 %v2778_v32, %v2810_v48  ;;  %v4268_v31 = vadd.f32 %v5579_v2, %v4156_v28  ;;  %v2637_v45 = vpop.f32.mrb[25].mxu0 }
 0x2f5   : > { %v2840_v26 = vmax.f32 %v2776_v40, %v2808_v37  ;;  %v4271_v0 = vadd.f32 %v5567_v39, %v2637_v45  ;;  %v4157_v20 = vpop.f32.mrb[26].mxu0 }
 0x2f6   : > { %v2781_v34 = vadd.f32 %v4268_v31, %v5665_v36  ;;  %v4274_v51 = vadd.f32 %v5585_v11, %v4157_v20  ;;  %v2640_v5 = vpop.f32.mrb[27].mxu0  ;;  %v2870_v50 = vpack.c.bf16 %v2842_v59, %v2841_v15 }
 0x2f7   : > { %v2779_v16 = vadd.f32 %v4271_v0, %v5665_v36  ;;  %v4277_v35 = vadd.f32 %v5573_v7, %v2640_v5  ;;  %v2869_v24 = vpack.c.bf16 %v2840_v26, %v2839_v30 }
 0x2f8   : > { %v2813_v56 = vmul.f32 0.01, %v2781_v34  ;;  %v2782_v2 = vadd.f32 %v4274_v51, %v5665_v36 }
 0x2f9   : > { %v2811_v21 = vmul.f32 0.01, %v2779_v16  ;;  %v2780_v47 = vadd.f32 %v4277_v35, %v5665_v36  ;;  %4198 = vmatprep.mubr.bf16.mxu1 %v2869_v24 }
 0x2fa   : > { %v2814_v39 = vmul.f32 0.01, %v2782_v2  ;;  %4199 = vmatmul.mubr.bf16.gmra.mrb[148].mxu1 %v2870_v50  ;;  %v2845_v46 = vmax.f32 %v2781_v34, %v2813_v56 }
 0x2fb   : > { %v2812_v57 = vmul.f32 0.01, %v2780_v47  ;;  %v4160_v17 = vpop.f32.mrb[28].mxu0  ;;  %v2843_v23 = vmax.f32 %v2779_v16, %v2811_v21 }
 0x2fc   : > { %v2846_v11 = vmax.f32 %v2782_v2, %v2814_v39  ;;  %v4280_v33 = vadd.f32 %v5603_v52, %v4160_v17  ;;  %v2653_v22 = vpop.f32.mrb[29].mxu0 }
 0x2fd   : > { %v2844_v49 = vmax.f32 %v2780_v47, %v2812_v57  ;;  %v4283_v7 = vadd.f32 %v5591_v6, %v2653_v22  ;;  %v4161_v61 = vpop.f32.mrb[30].mxu0 }
 0x2fe   : > { %v2785_v44 = vadd.f32 %v4280_v33, %v5665_v36  ;;  %v4286_v54 = vadd.f32 %v5609_v27, %v4161_v61  ;;  %v2656_v4 = vpop.f32.mrb[31].mxu0  ;;  %v2872_v12 = vpack.c.bf16 %v2846_v11, %v2845_v46 }
 0x2ff   : > { %v2783_v8 = vadd.f32 %v4283_v7, %v5665_v36  ;;  %v4289_v29 = vadd.f32 %v5597_v41, %v2656_v4  ;;  %v2871_v55 = vpack.c.bf16 %v2844_v49, %v2843_v23 }
 0x300   : > { %v2817_v32 = vmul.f32 0.01, %v2785_v44  ;;  %v2786_v52 = vadd.f32 %v4286_v54, %v5665_v36 }
 0x301   : > { %v2815_v14 = vmul.f32 0.01, %v2783_v8  ;;  %v2784_v40 = vadd.f32 %v4289_v29, %v5665_v36  ;;  %4202 = vmatprep.mubr.bf16.mxu1 %v2871_v55 }
 0x302   : > { %v2818_v6 = vmul.f32 0.01, %v2786_v52  ;;  %4203 = vmatmul.mubr.bf16.gmra.mrb[152].mxu1 %v2872_v12  ;;  %v2849_v28 = vmax.f32 %v2785_v44, %v2817_v32 }
 0x303   : > { %v2816_v48 = vmul.f32 0.01, %v2784_v40  ;;  %v4164_v37 = vpop.f32.mrb[32].mxu0  ;;  %v2847_v31 = vmax.f32 %v2783_v8, %v2815_v14 }
 0x304   : > { %v2850_v27 = vmax.f32 %v2786_v52, %v2818_v6  ;;  %v4292_v15 = vadd.f32 %v5621_v60, %v4164_v37  ;;  %v2669_v59 = vpop.f32.mrb[33].mxu0 }
 0x305   : > { %v2848_v45 = vmax.f32 %v2784_v40, %v2816_v48  ;;  %v4295_v41 = vadd.f32 %v5615_v43, %v2669_v59  ;;  %v4165_v30 = vpop.f32.mrb[34].mxu0 }
 0x306   : > { %v2789_v26 = vadd.f32 %v4292_v15, %v5665_v36  ;;  %v4298_v0 = vadd.f32 %v5624_v13, %v4165_v30  ;;  %v2672_v20 = vpop.f32.mrb[35].mxu0  ;;  %v2874_v34 = vpack.c.bf16 %v2850_v27, %v2849_v28 }
 0x307   : > { %v2787_v51 = vadd.f32 %v4295_v41, %v5665_v36  ;;  %v4301_v5 = vadd.f32 %v5618_v19, %v2672_v20  ;;  %v2873_v50 = vpack.c.bf16 %v2848_v45, %v2847_v31 }
 0x308   : > { %v2821_v16 = vmul.f32 0.01, %v2789_v26  ;;  %v2790_v60 = vadd.f32 %v4298_v0, %v5665_v36 }
 0x309   : > { %v2819_v35 = vmul.f32 0.01, %v2787_v51  ;;  %v2788_v24 = vadd.f32 %v4301_v5, %v5665_v36  ;;  %4206 = vmatprep.mubr.bf16.mxu1 %v2873_v50 }
 0x30a   : > { %v2822_v43 = vmul.f32 0.01, %v2790_v60  ;;  %4207 = vmatmul.mubr.bf16.gmra.mrb[156].mxu1 %v2874_v34  ;;  %v2853_v21 = vmax.f32 %v2789_v26, %v2821_v16 }
 0x30b   : > { %v2820_v56 = vmul.f32 0.01, %v2788_v24  ;;  %v4168_v2 = vpop.f32.mrb[36].mxu0  ;;  %v2851_v57 = vmax.f32 %v2787_v51, %v2819_v35 }
 0x30c   : > { %v2854_v13 = vmax.f32 %v2790_v60, %v2822_v43  ;;  %v4304_v47 = vadd.f32 %v5633_v1, %v4168_v2  ;;  %v2685_v39 = vpop.f32.mrb[37].mxu0 }
 0x30d   : > { %v2852_v17 = vmax.f32 %v2788_v24, %v2820_v56  ;;  %v4307_v19 = vadd.f32 %v5627_v10, %v2685_v39  ;;  %v4169_v46 = vpop.f32.mrb[38].mxu0 }
 0x30e   : > { %v2793_v11 = vadd.f32 %v4304_v47, %v5665_v36  ;;  %v4310_v33 = vadd.f32 %v5636_v25, %v4169_v46  ;;  %v2688_v22 = vpop.f32.mrb[39].mxu0  ;;  %v2876_v23 = vpack.c.bf16 %v2854_v13, %v2853_v21 }
 0x30f   : > { %v2791_v49 = vadd.f32 %v4307_v19, %v5665_v36  ;;  %v4313_v7 = vadd.f32 %v5630_v3, %v2688_v22  ;;  %v2875_v61 = vpack.c.bf16 %v2852_v17, %v2851_v57 }
 0x310   : > { %v2825_v44 = vmul.f32 0.01, %v2793_v11  ;;  %v2794_v1 = vadd.f32 %v4310_v33, %v5665_v36  ;;  %v3117_v33 = vld [vmem:[%s4574_s12 + $0x10] sm:$0xff] }
 0x311   : > { %v2823_v54 = vmul.f32 0.01, %v2791_v49  ;;  %v2792_v4 = vadd.f32 %v4313_v7, %v5665_v36  ;;  %4210 = vmatprep.mubr.bf16.mxu1 %v2875_v61 }
 0x312   : > { %v2826_v10 = vmul.f32 0.01, %v2794_v1  ;;  %4211 = vmatmul.mubr.bf16.gmra.mrb[160].mxu1 %v2876_v23  ;;  %v2857_v29 = vmax.f32 %v2793_v11, %v2825_v44  ;;  %v5734_v11 = vld [vmem:[%s5848_s6] ss:$0 sm:$0xff]  ;;  %v3118_v44 = vld [vmem:[%s4574_s12 + $0x18] sm:$0xff] }
 0x313   : > { %v2824_v12 = vmul.f32 0.01, %v2792_v4  ;;  %v4172_v8 = vpop.f32.mrb[40].mxu0  ;;  %v2855_v52 = vmax.f32 %v2791_v49, %v2823_v54  ;;  %v3115_v49 = vld [vmem:[%s4574_s12] sm:$0xff] }
 0x314   : > { %v2858_v25 = vmax.f32 %v2794_v1, %v2826_v10  ;;  %v4316_v55 = vadd.f32 %v5645_v53, %v4172_v8  ;;  %v2701_v32 = vpop.f32.mrb[41].mxu0  ;;  %v3116_v10 = vld [vmem:[%s4574_s12 + $0x8] sm:$0xff] }
 0x315   : > { %v2856_v14 = vmax.f32 %v2792_v4, %v2824_v12  ;;  %v4319_v3 = vadd.f32 %v5639_v38, %v2701_v32  ;;  %v4173_v40 = vpop.f32.mrb[42].mxu0 }
 0x316   : > { %v2797_v6 = vadd.f32 %v4316_v55, %v5665_v36  ;;  %v4322_v48 = vadd.f32 %v5648_v42, %v4173_v40  ;;  %v2704_v37 = vpop.f32.mrb[43].mxu0  ;;  %v2878_v28 = vpack.c.bf16 %v2858_v25, %v2857_v29 }
 0x317   : > { %v2795_v27 = vadd.f32 %v4319_v3, %v5665_v36  ;;  %v4325_v15 = vadd.f32 %v5642_v63, %v2704_v37  ;;  %v2877_v59 = vpack.c.bf16 %v2856_v14, %v2855_v52 }
 0x318   : > { %v2829_v31 = vmul.f32 0.01, %v2797_v6  ;;  %v2798_v53 = vadd.f32 %v4322_v48, %v5665_v36  ;;  %v3121_v48 = vld [vmem:[%s4574_s12 + $0x30] sm:$0xff] }
 0x319   : > { %v2827_v45 = vmul.f32 0.01, %v2795_v27  ;;  %v2796_v41 = vadd.f32 %v4325_v15, %v5665_v36  ;;  %4214 = vmatprep.mubr.bf16.mxu1 %v2877_v59  ;;  %v3119_v15 = vld [vmem:[%s4574_s12 + $0x20] sm:$0xff] }
 0x31a   : > { %v2830_v38 = vmul.f32 0.01, %v2798_v53  ;;  %4215 = vmatmul.mubr.bf16.gmra.mrb[164].mxu1 %v2878_v28  ;;  %v2861_v0 = vmax.f32 %v2797_v6, %v2829_v31 }
 0x31b   : > { %v2828_v30 = vmul.f32 0.01, %v2796_v41  ;;  %v4176_v26 = vpop.f32.mrb[44].mxu0  ;;  %v2859_v51 = vmax.f32 %v2795_v27, %v2827_v45  ;;  %v3122_v45 = vld [vmem:[%s4574_s12 + $0x38] sm:$0xff] }
 0x31c   : > { %v2862_v42 = vmax.f32 %v2798_v53, %v2830_v38  ;;  %v4328_v20 = vadd.f32 %v5657_v18, %v4176_v26  ;;  %v2717_v34 = vpop.f32.mrb[45].mxu0  ;;  %v3120_v26 = vld [vmem:[%s4574_s12 + $0x28] sm:$0xff] }
 0x31d   : > { %v2860_v5 = vmax.f32 %v2796_v41, %v2828_v30  ;;  %v4331_v63 = vadd.f32 %v5651_v58, %v2717_v34  ;;  %v4177_v50 = vpop.f32.mrb[46].mxu0 }
 0x31e   : > { %v2801_v16 = vadd.f32 %v4328_v20, %v5665_v36  ;;  %v4334_v60 = vadd.f32 %v5660_v62, %v4177_v50  ;;  %v2720_v35 = vpop.f32.mrb[47].mxu0  ;;  %v2880_v24 = vpack.c.bf16 %v2862_v42, %v2861_v0 }
 0x31f   : > { %v2799_v43 = vadd.f32 %v4331_v63, %v5665_v36  ;;  %v4337_v56 = vadd.f32 %v5654_v9, %v2720_v35  ;;  %v2879_v2 = vpack.c.bf16 %v2860_v5, %v2859_v51 }
 0x320   : > { %v2833_v21 = vmul.f32 0.01, %v2801_v16  ;;  %v2802_v18 = vadd.f32 %v4334_v60, %v5665_v36 }
 0x321   : > { %v2831_v13 = vmul.f32 0.01, %v2799_v43  ;;  %v2800_v47 = vadd.f32 %v4337_v56, %v5665_v36  ;;  %4218 = vmatprep.mubr.bf16.mxu1 %v2879_v2 }
 0x322   : > { %v2834_v58 = vmul.f32 0.01, %v2802_v18  ;;  %4219 = vmatmul.mubr.bf16.gmra.mrb[168].mxu1 %v2880_v24  ;;  %v2865_v62 = vmax.f32 %v2801_v16, %v2833_v21  ;;  %v3125_v24 = vld [vmem:[%s4574_s12 + $0x50] sm:$0xff]  ;;  %v3123_v21 = vld [vmem:[%s4574_s12 + $0x40] sm:$0xff] }
 0x323   : > { %v2832_v39 = vmul.f32 0.01, %v2800_v47  ;;  %v2863_v17 = vmax.f32 %v2799_v43, %v2831_v13 }
 0x324   : > { %v2866_v57 = vmax.f32 %v2802_v18, %v2834_v58  ;;  %v3126_v58 = vld [vmem:[%s4574_s12 + $0x58] sm:$0xff] }
 0x325   : > { %v2864_v19 = vmax.f32 %v2800_v47, %v2832_v39 }
 0x326   : > { %v2882_v46 = vpack.c.bf16 %v2866_v57, %v2865_v62 }
 0x327   : > { %v2881_v9 = vpack.c.bf16 %v2864_v19, %v2863_v17  ;;  %v3124_v17 = vld [vmem:[%s4574_s12 + $0x48] sm:$0xff] }
 0x329   : > { %4222 = vmatprep.mubr.bf16.mxu1 %v2881_v9 }
 0x32a   : > { %4223 = vmatmul.mubr.bf16.gmra.mrb[172].mxu1 %v2882_v46 }
 0x3c5   : > { %v4196_v36 = vpop.f32.mrb[144].mxu1 }
 0x3c6   : > { %v2997_v22 = vadd.f32 %v4196_v36, %v5734_v11  ;;  %v2988_v23 = vpop.f32.mrb[145].mxu1 }
 0x3c7   : > { %v2989_v7 = vadd.f32 %v5734_v11, %v2988_v23  ;;  %v4197_v61 = vpop.f32.mrb[146].mxu1 }
 0x3c8   : > { %v3149_v1 = vadd.f32 %v3117_v33, %v2997_v22  ;;  %v3000_v54 = vadd.f32 %v4197_v61, %v5734_v11  ;;  %v2991_v4 = vpop.f32.mrb[147].mxu1 }
 0x3c9   : > { %v3147_v12 = vadd.f32 %v3115_v49, %v2989_v7  ;;  %v2992_v8 = vadd.f32 %v5734_v11, %v2991_v4 }
 0x3ca   : > { %v3181_v29 = vmul.f32 0.01, %v3149_v1  ;;  %v3150_v25 = vadd.f32 %v3118_v44, %v3000_v54 }
 0x3cb   : > { %v3179_v55 = vmul.f32 0.01, %v3147_v12  ;;  %v3148_v32 = vadd.f32 %v3116_v10, %v2992_v8 }
 0x3cc   : > { %v3213_v52 = vmax.f32 %v3149_v1, %v3181_v29  ;;  %v3182_v14 = vmul.f32 0.01, %v3150_v25  ;;  %v3129_v1 = vld [vmem:[%s4574_s12 + $0x70] sm:$0xff] }
 0x3cd   : > { %v3211_v3 = vmax.f32 %v3147_v12, %v3179_v55  ;;  %v3180_v40 = vmul.f32 0.01, %v3148_v32  ;;  %v4200_v6 = vpop.f32.mrb[148].mxu1  ;;  %v3127_v12 = vld [vmem:[%s4574_s12 + $0x60] sm:$0xff]  ;;  %v3130_v55 = vld [vmem:[%s4574_s12 + $0x78] sm:$0xff] }
 0x3ce   : > { %3245 = vst [vmem:[%s5749_s20 + $0x10] sm:$0xff] %v3213_v52  ;;  %v3214_v37 = vmax.f32 %v3150_v25, %v3182_v14  ;;  %v3013_v28 = vadd.f32 %v4200_v6, %v5734_v11  ;;  %v3004_v27 = vpop.f32.mrb[149].mxu1 }
 0x3cf   : > { %3243 = vst [vmem:[%s5749_s20] sm:$0xff] %v3211_v3  ;;  %v3212_v59 = vmax.f32 %v3148_v32, %v3180_v40  ;;  %v3005_v31 = vadd.f32 %v5734_v11, %v3004_v27  ;;  %v4201_v53 = vpop.f32.mrb[150].mxu1  ;;  %v3128_v3 = vld [vmem:[%s4574_s12 + $0x68] sm:$0xff] }
 0x3d0   : > { %3246 = vst [vmem:[%s5749_s20 + $0x18] sm:$0xff] %v3214_v37  ;;  %v3153_v41 = vadd.f32 %v3121_v48, %v3013_v28  ;;  %v3016_v38 = vadd.f32 %v4201_v53, %v5734_v11  ;;  %v3007_v30 = vpop.f32.mrb[151].mxu1 }
 0x3d1   : > { %3244 = vst [vmem:[%s5749_s20 + $0x8] sm:$0xff] %v3212_v59  ;;  %v3151_v0 = vadd.f32 %v3119_v15, %v3005_v31  ;;  %v3008_v42 = vadd.f32 %v5734_v11, %v3007_v30 }
 0x3d2   : > { %v3185_v20 = vmul.f32 0.01, %v3153_v41  ;;  %v3154_v34 = vadd.f32 %v3122_v45, %v3016_v38 }
 0x3d3   : > { %v3183_v51 = vmul.f32 0.01, %v3151_v0  ;;  %v3152_v5 = vadd.f32 %v3120_v26, %v3008_v42 }
 0x3d4   : > { %v3217_v63 = vmax.f32 %v3153_v41, %v3185_v20  ;;  %v3186_v50 = vmul.f32 0.01, %v3154_v34  ;;  %v3133_v41 = vld [vmem:[%s4574_s12 + $0x90] sm:$0xff] }
 0x3d5   : > { %v3215_v16 = vmax.f32 %v3151_v0, %v3183_v51  ;;  %v3184_v60 = vmul.f32 0.01, %v3152_v5  ;;  %v4204_v35 = vpop.f32.mrb[152].mxu1  ;;  %v3131_v0 = vld [vmem:[%s4574_s12 + $0x80] sm:$0xff]  ;;  %v3134_v51 = vld [vmem:[%s4574_s12 + $0x98] sm:$0xff] }
 0x3d6   : > { %3249 = vst [vmem:[%s5749_s20 + $0x30] sm:$0xff] %v3217_v63  ;;  %v3218_v43 = vmax.f32 %v3154_v34, %v3186_v50  ;;  %v3029_v56 = vadd.f32 %v4204_v35, %v5734_v11  ;;  %v3020_v2 = vpop.f32.mrb[153].mxu1 }
 0x3d7   : > { %3247 = vst [vmem:[%s5749_s20 + $0x20] sm:$0xff] %v3215_v16  ;;  %v3216_v18 = vmax.f32 %v3152_v5, %v3184_v60  ;;  %v3021_v13 = vadd.f32 %v5734_v11, %v3020_v2  ;;  %v4205_v47 = vpop.f32.mrb[154].mxu1  ;;  %v3132_v16 = vld [vmem:[%s4574_s12 + $0x88] sm:$0xff] }
 0x3d8   : > { %3250 = vst [vmem:[%s5749_s20 + $0x38] sm:$0xff] %v3218_v43  ;;  %v3157_v39 = vadd.f32 %v3125_v24, %v3029_v56  ;;  %v3032_v62 = vadd.f32 %v4205_v47, %v5734_v11  ;;  %v3023_v57 = vpop.f32.mrb[155].mxu1 }
 0x3d9   : > { %3248 = vst [vmem:[%s5749_s20 + $0x28] sm:$0xff] %v3216_v18  ;;  %v3155_v19 = vadd.f32 %v3123_v21, %v3021_v13  ;;  %v3024_v46 = vadd.f32 %v5734_v11, %v3023_v57 }
 0x3da   : > { %v3189_v9 = vmul.f32 0.01, %v3157_v39  ;;  %v3158_v36 = vadd.f32 %v3126_v58, %v3032_v62 }
 0x3db   : > { %v3187_v33 = vmul.f32 0.01, %v3155_v19  ;;  %v3156_v22 = vadd.f32 %v3124_v17, %v3024_v46 }
 0x3dc   : > { %v3221_v23 = vmax.f32 %v3157_v39, %v3189_v9  ;;  %v3190_v49 = vmul.f32 0.01, %v3158_v36  ;;  %v3137_v39 = vld [vmem:[%s4574_s12 + $0xb0] sm:$0xff] }
 0x3dd   : > { %v3219_v7 = vmax.f32 %v3155_v19, %v3187_v33  ;;  %v3188_v61 = vmul.f32 0.01, %v3156_v22  ;;  %v4208_v44 = vpop.f32.mrb[156].mxu1  ;;  %v3135_v19 = vld [vmem:[%s4574_s12 + $0xa0] sm:$0xff]  ;;  %v3138_v33 = vld [vmem:[%s4574_s12 + $0xb8] sm:$0xff] }
 0x3de   : > { %3253 = vst [vmem:[%s5749_s20 + $0x50] sm:$0xff] %v3221_v23  ;;  %v3222_v54 = vmax.f32 %v3158_v36, %v3190_v49  ;;  %v3045_v4 = vadd.f32 %v4208_v44, %v5734_v11  ;;  %v3036_v10 = vpop.f32.mrb[157].mxu1 }
 0x3df   : > { %3251 = vst [vmem:[%s5749_s20 + $0x40] sm:$0xff] %v3219_v7  ;;  %v3220_v8 = vmax.f32 %v3156_v22, %v3188_v61  ;;  %v3037_v29 = vadd.f32 %v5734_v11, %v3036_v10  ;;  %v4209_v25 = vpop.f32.mrb[158].mxu1  ;;  %v3136_v7 = vld [vmem:[%s4574_s12 + $0xa8] sm:$0xff] }
 0x3e0   : > { %3254 = vst [vmem:[%s5749_s20 + $0x58] sm:$0xff] %v3222_v54  ;;  %v3161_v32 = vadd.f32 %v3129_v1, %v3045_v4  ;;  %v3048_v52 = vadd.f32 %v4209_v25, %v5734_v11  ;;  %v3039_v14 = vpop.f32.mrb[159].mxu1 }
 0x3e1   : > { %3252 = vst [vmem:[%s5749_s20 + $0x48] sm:$0xff] %v3220_v8  ;;  %v3159_v40 = vadd.f32 %v3127_v12, %v3037_v29  ;;  %v3040_v6 = vadd.f32 %v5734_v11, %v3039_v14 }
 0x3e2   : > { %v3193_v48 = vmul.f32 0.01, %v3161_v32  ;;  %v3162_v37 = vadd.f32 %v3130_v55, %v3048_v52 }
 0x3e3   : > { %v3191_v28 = vmul.f32 0.01, %v3159_v40  ;;  %v3160_v27 = vadd.f32 %v3128_v3, %v3040_v6 }
 0x3e4   : > { %v3225_v15 = vmax.f32 %v3161_v32, %v3193_v48  ;;  %v3194_v59 = vmul.f32 0.01, %v3162_v37  ;;  %v3141_v32 = vld [vmem:[%s4574_s12 + $0xd0] sm:$0xff] }
 0x3e5   : > { %v3223_v31 = vmax.f32 %v3159_v40, %v3191_v28  ;;  %v3192_v53 = vmul.f32 0.01, %v3160_v27  ;;  %v4212_v45 = vpop.f32.mrb[160].mxu1  ;;  %v3139_v40 = vld [vmem:[%s4574_s12 + $0xc0] sm:$0xff]  ;;  %v3142_v28 = vld [vmem:[%s4574_s12 + $0xd8] sm:$0xff] }
 0x3e6   : > { %3257 = vst [vmem:[%s5749_s20 + $0x70] sm:$0xff] %v3225_v15  ;;  %v3226_v38 = vmax.f32 %v3162_v37, %v3194_v59  ;;  %v3061_v30 = vadd.f32 %v4212_v45, %v5734_v11  ;;  %v3052_v26 = vpop.f32.mrb[161].mxu1 }
 0x3e7   : > { %3255 = vst [vmem:[%s5749_s20 + $0x60] sm:$0xff] %v3223_v31  ;;  %v3224_v42 = vmax.f32 %v3160_v27, %v3192_v53  ;;  %v3053_v20 = vadd.f32 %v5734_v11, %v3052_v26  ;;  %v4213_v34 = vpop.f32.mrb[162].mxu1  ;;  %v3140_v31 = vld [vmem:[%s4574_s12 + $0xc8] sm:$0xff] }
 0x3e8   : > { %3258 = vst [vmem:[%s5749_s20 + $0x78] sm:$0xff] %v3226_v38  ;;  %v3165_v5 = vadd.f32 %v3133_v41, %v3061_v30  ;;  %v3064_v63 = vadd.f32 %v4213_v34, %v5734_v11  ;;  %v3055_v50 = vpop.f32.mrb[163].mxu1 }
 0x3e9   : > { %3256 = vst [vmem:[%s5749_s20 + $0x68] sm:$0xff] %v3224_v42  ;;  %v3163_v60 = vadd.f32 %v3131_v0, %v3053_v20  ;;  %v3056_v35 = vadd.f32 %v5734_v11, %v3055_v50 }
 0x3ea   : > { %v3197_v24 = vmul.f32 0.01, %v3165_v5  ;;  %v3166_v43 = vadd.f32 %v3134_v51, %v3064_v63 }
 0x3eb   : > { %v3195_v56 = vmul.f32 0.01, %v3163_v60  ;;  %v3164_v2 = vadd.f32 %v3132_v16, %v3056_v35 }
 0x3ec   : > { %v3229_v21 = vmax.f32 %v3165_v5, %v3197_v24  ;;  %v3198_v18 = vmul.f32 0.01, %v3166_v43  ;;  %v3145_v5 = vld [vmem:[%s4574_s12 + $0xf0] sm:$0xff] }
 0x3ed   : > { %v3227_v13 = vmax.f32 %v3163_v60, %v3195_v56  ;;  %v3196_v47 = vmul.f32 0.01, %v3164_v2  ;;  %v4216_v58 = vpop.f32.mrb[164].mxu1  ;;  %v3143_v60 = vld [vmem:[%s4574_s12 + $0xe0] sm:$0xff]  ;;  %v3146_v56 = vld [vmem:[%s4574_s12 + $0xf8] sm:$0xff] }
 0x3ee   : > { %3261 = vst [vmem:[%s5749_s20 + $0x90] sm:$0xff] %v3229_v21  ;;  %v3230_v62 = vmax.f32 %v3166_v43, %v3198_v18  ;;  %v3077_v57 = vadd.f32 %v4216_v58, %v5734_v11  ;;  %v3068_v17 = vpop.f32.mrb[165].mxu1 }
 0x3ef   : > { %3259 = vst [vmem:[%s5749_s20 + $0x80] sm:$0xff] %v3227_v13  ;;  %v3228_v46 = vmax.f32 %v3164_v2, %v3196_v47  ;;  %v3069_v9 = vadd.f32 %v5734_v11, %v3068_v17  ;;  %v4217_v36 = vpop.f32.mrb[166].mxu1  ;;  %v3144_v13 = vld [vmem:[%s4574_s12 + $0xe8] sm:$0xff] }
 0x3f0   : > { %3262 = vst [vmem:[%s5749_s20 + $0x98] sm:$0xff] %v3230_v62  ;;  %v3169_v22 = vadd.f32 %v3137_v39, %v3077_v57  ;;  %v3080_v23 = vadd.f32 %v4217_v36, %v5734_v11  ;;  %v3071_v49 = vpop.f32.mrb[167].mxu1 }
 0x3f1   : > { %3260 = vst [vmem:[%s5749_s20 + $0x88] sm:$0xff] %v3228_v46  ;;  %v3167_v61 = vadd.f32 %v3135_v19, %v3069_v9  ;;  %v3072_v44 = vadd.f32 %v5734_v11, %v3071_v49 }
 0x3f2   : > { %v3201_v1 = vmul.f32 0.01, %v3169_v22  ;;  %v3170_v54 = vadd.f32 %v3138_v33, %v3080_v23 }
 0x3f3   : > { %v3199_v4 = vmul.f32 0.01, %v3167_v61  ;;  %v3168_v10 = vadd.f32 %v3136_v7, %v3072_v44 }
 0x3f4   : > { %v3233_v12 = vmax.f32 %v3169_v22, %v3201_v1  ;;  %v3202_v8 = vmul.f32 0.01, %v3170_v54 }
 0x3f5   : > { %v3231_v29 = vmax.f32 %v3167_v61, %v3199_v4  ;;  %v3200_v25 = vmul.f32 0.01, %v3168_v10  ;;  %v4220_v55 = vpop.f32.mrb[168].mxu1 }
 0x3f6   : > { %3265 = vst [vmem:[%s5749_s20 + $0xb0] sm:$0xff] %v3233_v12  ;;  %v3234_v52 = vmax.f32 %v3170_v54, %v3202_v8  ;;  %v3093_v14 = vadd.f32 %v4220_v55, %v5734_v11  ;;  %v3084_v3 = vpop.f32.mrb[169].mxu1 }
 0x3f7   : > { %3263 = vst [vmem:[%s5749_s20 + $0xa0] sm:$0xff] %v3231_v29  ;;  %v3232_v6 = vmax.f32 %v3168_v10, %v3200_v25  ;;  %v3085_v48 = vadd.f32 %v5734_v11, %v3084_v3  ;;  %v4221_v37 = vpop.f32.mrb[170].mxu1 }
 0x3f8   : > { %3266 = vst [vmem:[%s5749_s20 + $0xb8] sm:$0xff] %v3234_v52  ;;  %v3173_v27 = vadd.f32 %v3141_v32, %v3093_v14  ;;  %v3096_v15 = vadd.f32 %v4221_v37, %v5734_v11  ;;  %v3087_v59 = vpop.f32.mrb[171].mxu1 }
 0x3f9   : > { %3264 = vst [vmem:[%s5749_s20 + $0xa8] sm:$0xff] %v3232_v6  ;;  %v3171_v53 = vadd.f32 %v3139_v40, %v3085_v48  ;;  %v3088_v45 = vadd.f32 %v5734_v11, %v3087_v59 }
 0x3fa   : > { %v3205_v41 = vmul.f32 0.01, %v3173_v27  ;;  %v3174_v38 = vadd.f32 %v3142_v28, %v3096_v15 }
 0x3fb   : > { %v3203_v30 = vmul.f32 0.01, %v3171_v53  ;;  %v3172_v26 = vadd.f32 %v3140_v31, %v3088_v45 }
 0x3fc   : > { %v3237_v0 = vmax.f32 %v3173_v27, %v3205_v41  ;;  %v3206_v42 = vmul.f32 0.01, %v3174_v38 }
 0x3fd   : > { %v3235_v20 = vmax.f32 %v3171_v53, %v3203_v30  ;;  %v3204_v34 = vmul.f32 0.01, %v3172_v26  ;;  %v4224_v51 = vpop.f32.mrb[172].mxu1 }
 0x3fe   : > { %3269 = vst [vmem:[%s5749_s20 + $0xd0] sm:$0xff] %v3237_v0  ;;  %v3238_v63 = vmax.f32 %v3174_v38, %v3206_v42  ;;  %v3109_v50 = vadd.f32 %v4224_v51, %v5734_v11  ;;  %v3100_v16 = vpop.f32.mrb[173].mxu1 }
 0x3ff   : > { %3267 = vst [vmem:[%s5749_s20 + $0xc0] sm:$0xff] %v3235_v20  ;;  %v3236_v35 = vmax.f32 %v3172_v26, %v3204_v34  ;;  %v3101_v24 = vadd.f32 %v5734_v11, %v3100_v16  ;;  %v4225_v43 = vpop.f32.mrb[174].mxu1 }
 0x400   : > { %3270 = vst [vmem:[%s5749_s20 + $0xd8] sm:$0xff] %v3238_v63  ;;  %v3177_v2 = vadd.f32 %v3145_v5, %v3109_v50  ;;  %v3112_v21 = vadd.f32 %v4225_v43, %v5734_v11  ;;  %v3103_v18 = vpop.f32.mrb[175].mxu1 }
 0x401   : > { %3268 = vst [vmem:[%s5749_s20 + $0xc8] sm:$0xff] %v3236_v35  ;;  %v3175_v47 = vadd.f32 %v3143_v60, %v3101_v24  ;;  %v3104_v58 = vadd.f32 %v5734_v11, %v3103_v18 }
 0x402   : > { %v3209_v39 = vmul.f32 0.01, %v3177_v2  ;;  %v3178_v62 = vadd.f32 %v3146_v56, %v3112_v21 }
 0x403   : > { %v3207_v57 = vmul.f32 0.01, %v3175_v47  ;;  %v3176_v17 = vadd.f32 %v3144_v13, %v3104_v58 }
 0x404   : > { %v3241_v19 = vmax.f32 %v3177_v2, %v3209_v39  ;;  %v3210_v46 = vmul.f32 0.01, %v3178_v62 }
 0x405   : > { %v3239_v9 = vmax.f32 %v3175_v47, %v3207_v57  ;;  %v3208_v36 = vmul.f32 0.01, %v3176_v17 }
 0x406   : > { %3273 = vst [vmem:[%s5749_s20 + $0xf0] sm:$0xff] %v3241_v19  ;;  %v3242_v33 = vmax.f32 %v3178_v62, %v3210_v46 }
 0x407   : > { %3271 = vst [vmem:[%s5749_s20 + $0xe0] sm:$0xff] %v3239_v9  ;;  %v3240_v22 = vmax.f32 %v3176_v17, %v3208_v36 }
 0x408   : > { %3274 = vst [vmem:[%s5749_s20 + $0xf8] sm:$0xff] %v3242_v33 }
 0x409   : > { %3272 = vst [vmem:[%s5749_s20 + $0xe8] sm:$0xff] %v3240_v22 }
 0x40a PF: > { %s17_s24 = sadd.s32 1, %s4506_s24  }
 0x40b   : > { %p14_p4 = scmp.ge.s32.totalorder %s17_s24, 4  }
 0x40d   :  { %16 = sbr.rel (!%p14_p4) target bundleno = 1 (0x1), region = 83 }

</bundles_post_ra>
